<compile_context>
chip_gen: v5e
topology: v5e:2x2
jax: 0.10.0
libtpu: 0.0.40
codegen_flags: <defaults>
</compile_context>

<pallas_src>
import functools

import jax
import jax.numpy as jnp
from jax import lax
from jax.experimental import pallas as pl
from jax.experimental.pallas import tpu as pltpu


_VMEM_LIMIT_BYTES = 32 * 1024 * 1024  # <= physical VMEM on v5e/v6e (128 MiB) and v7x (64 MiB)


def _dwpw_stats_kernel(x_ref, wdw_ref, bdw_ref, wpw_ref, bpw_ref,
                       z_ref, stats_ref, xpad_ref, *,
                       ksize, stride, dilation, pad, out_h, out_w):
    """Pass 1 (one batch sample per grid step).

    x_ref    : (1, H, W, Cin)       un-padded NHWC input block
    wdw_ref  : (K*K, Cin)           depthwise weights, tap-major
    bdw_ref  : (1, Cin)             depthwise bias
    wpw_ref  : (Cin, Cout)          pointwise weights
    bpw_ref  : (1, Cout)            pointwise bias
    z_ref    : (1, out_h*out_w, Cout)  pre-BN activations (f32 intermediate)
    stats_ref: (1, 2, Cout)         per-sample [sum, sum_sq] over out_h*out_w
    xpad_ref : (Hp, Wp, Cin)        VMEM scratch holding the zero-padded sample
    """
    h, w, cin = x_ref.shape[1], x_ref.shape[2], x_ref.shape[3]
    cout = wpw_ref.shape[1]

    # --- zero-pad into VMEM scratch (no padded copy written to / read from HBM) ---
    xpad_ref[...] = jnp.zeros_like(xpad_ref)
    xpad_ref[pl.ds(pad, h), pl.ds(pad, w), :] = x_ref[0].astype(xpad_ref.dtype)

    # --- depthwise KxK conv: shifted windows read directly through the ref ---
    wdw = wdw_ref[...].astype(jnp.float32)            # hoisted (K*K, Cin) load
    acc = jnp.zeros((out_h, out_w, cin), jnp.float32)
    for kh in range(ksize):
        for kw in range(ksize):
            h0 = kh * dilation                        # static Python offsets
            w0 = kw * dilation
            if stride == 1:
                win = xpad_ref[pl.ds(h0, out_h), pl.ds(w0, out_w), :]
            else:
                win = xpad_ref[pl.ds(h0, out_h, stride=stride),
                               pl.ds(w0, out_w, stride=stride), :]
            acc = acc + win * wdw[kh * ksize + kw][None, None, :]
    acc = acc + bdw_ref[0].astype(jnp.float32)[None, None, :]

    # --- pointwise 1x1 conv == (out_h*out_w, Cin) @ (Cin, Cout) on the MXU ---
    # Feed bf16 operands when the input is bf16 (v6e/v7x fast path); f32 accumulate.
    mm_dtype = jnp.bfloat16 if x_ref.dtype == jnp.bfloat16 else jnp.float32
    y = acc.reshape(out_h * out_w, cin).astype(mm_dtype)
    z = jnp.dot(y, wpw_ref[...].astype(mm_dtype),
                preferred_element_type=jnp.float32)
    z = z + bpw_ref[0].astype(jnp.float32)[None, :]

    # --- per-sample partial BatchNorm statistics (finalized outside the grid) ---
    stats_ref[0, 0:1, :] = jnp.sum(z, axis=0, keepdims=True)
    stats_ref[0, 1:2, :] = jnp.sum(z * z, axis=0, keepdims=True)

    # --- pre-BN activations, f32 intermediate ---
    z_ref[0] = z


def _bn_apply_kernel(z_ref, scale_ref, shift_ref, o_ref):
    """Pass 2: lane-dense per-channel affine apply (BatchNorm folded to scale/shift).

    z_ref     : (1, TH, out_w*Cout)  f32
    scale_ref : (1, 1,  out_w*Cout)  per-channel scale tiled along out_w
    shift_ref : (1, 1,  out_w*Cout)
    o_ref     : (1, TH, out_w*Cout)  output dtype
    """
    o_ref[...] = (z_ref[...] * scale_ref[...] + shift_ref[...]).astype(o_ref.dtype)


def depthwise_separable_conv(x_nchw, w_dw, b_dw, w_pw, b_pw, gamma, beta,
                             *, ksize=3, stride=1, dilation=1, eps=1e-5):
    """x_nchw: (N, Cin, H, W).  Weight shapes follow the PyTorch module:
       w_dw: (Cin, 1, K, K), b_dw: (Cin,), w_pw: (Cout, Cin, 1, 1), b_pw: (Cout,)."""
    n, cin, h, w = x_nchw.shape
    cout = w_pw.shape[0]
    pad = (ksize // 2) * dilation
    out_h = (h + 2 * pad - dilation * (ksize - 1) - 1) // stride + 1
    out_w = (w + 2 * pad - dilation * (ksize - 1) - 1) // stride + 1
    hp, wp = h + 2 * pad, w + 2 * pad
    m = out_h * out_w

    # ---- layout glue (stays in XLA): NCHW -> NHWC, weight reshapes ----
    x_nhwc = jnp.transpose(x_nchw, (0, 2, 3, 1))
    wdw = jnp.transpose(w_dw[:, 0, :, :], (1, 2, 0)).reshape(ksize * ksize, cin)  # (K*K, Cin)
    wpw = jnp.transpose(w_pw[:, :, 0, 0], (1, 0))                                  # (Cin, Cout)
    bdw = b_dw.reshape(1, cin)
    bpw = b_pw.reshape(1, cout)

    # ================= Pass 1: depthwise + pointwise + partial BN stats =================
    kernel1 = functools.partial(
        _dwpw_stats_kernel,
        ksize=ksize, stride=stride, dilation=dilation, pad=pad,
        out_h=out_h, out_w=out_w,
    )
    z, stats = pl.pallas_call(
        kernel1,
        grid=(n,),
        in_specs=[
            pl.BlockSpec((1, h, w, cin), lambda i: (i, 0, 0, 0)),
            pl.BlockSpec((ksize * ksize, cin), lambda i: (0, 0)),
            pl.BlockSpec((1, cin), lambda i: (0, 0)),
            pl.BlockSpec((cin, cout), lambda i: (0, 0)),
            pl.BlockSpec((1, cout), lambda i: (0, 0)),
        ],
        out_specs=(
            pl.BlockSpec((1, m, cout), lambda i: (i, 0, 0)),
            pl.BlockSpec((1, 2, cout), lambda i: (i, 0, 0)),
        ),
        out_shape=(
            jax.ShapeDtypeStruct((n, m, cout), jnp.float32),
            jax.ShapeDtypeStruct((n, 2, cout), jnp.float32),
        ),
        scratch_shapes=[pltpu.VMEM((hp, wp, cin), jnp.float32)],
        compiler_params=pltpu.CompilerParams(
            dimension_semantics=("parallel",),          # batch steps are independent
            vmem_limit_bytes=_VMEM_LIMIT_BYTES,
        ),
    )(x_nhwc, wdw, bdw, wpw, bpw)

    # ---- finalize BN stats (tiny: N*2*Cout values) and fold into scale/shift ----
    count = float(n * m)
    s = jnp.sum(stats[:, 0, :], axis=0)
    ss = jnp.sum(stats[:, 1, :], axis=0)
    mean = s / count
    var = jnp.maximum(ss / count - mean * mean, 0.0)     # biased (training-mode) variance
    scale = gamma.astype(jnp.float32) * lax.rsqrt(var + eps)
    shift = beta.astype(jnp.float32) - mean * scale

    # ================= Pass 2: lane-dense BN affine apply =================
    owc = out_w * cout
    z_slab = z.reshape(n, out_h, owc)                    # free: merges trailing dims
    scale_slab = jnp.tile(scale, out_w).reshape(1, 1, owc)
    shift_slab = jnp.tile(shift, out_w).reshape(1, 1, owc)

    th = out_h if out_h <= 128 else 128                  # row tile for large images
    o_slab = pl.pallas_call(
        _bn_apply_kernel,
        grid=(n, pl.cdiv(out_h, th)),
        in_specs=[
            pl.BlockSpec((1, th, owc), lambda i, r: (i, r, 0)),
            pl.BlockSpec((1, 1, owc), lambda i, r: (0, 0, 0)),
            pl.BlockSpec((1, 1, owc), lambda i, r: (0, 0, 0)),
        ],
        out_specs=pl.BlockSpec((1, th, owc), lambda i, r: (i, r, 0)),
        out_shape=jax.ShapeDtypeStruct((n, out_h, owc), x_nchw.dtype),
        compiler_params=pltpu.CompilerParams(
            dimension_semantics=("parallel", "parallel"),
            vmem_limit_bytes=_VMEM_LIMIT_BYTES,
        ),
    )(z_slab, scale_slab, shift_slab)

    out_nhwc = o_slab.reshape(n, out_h, out_w, cout)     # free reshape
    return jnp.transpose(out_nhwc, (0, 3, 1, 2))         # back to NCHW


def _reference(x, w_dw, b_dw, w_pw, b_pw, gamma, beta, *, stride=1, dilation=1, eps=1e-5):
    """Pure-JAX reference mirroring the PyTorch module (training-mode BN)."""
    cin = x.shape[1]
    pad = (w_dw.shape[-1] // 2) * dilation
    y = lax.conv_general_dilated(
        x, w_dw, window_strides=(stride, stride),
        padding=((pad, pad), (pad, pad)),
        rhs_dilation=(dilation, dilation),
        dimension_numbers=("NCHW", "OIHW", "NCHW"),
        feature_group_count=cin,
    ) + b_dw[None, :, None, None]
    z = lax.conv_general_dilated(
        y, w_pw, window_strides=(1, 1), padding=((0, 0), (0, 0)),
        dimension_numbers=("NCHW", "OIHW", "NCHW"),
    ) + b_pw[None, :, None, None]
    mean = jnp.mean(z, axis=(0, 2, 3), keepdims=True)
    var = jnp.mean((z - mean) ** 2, axis=(0, 2, 3), keepdims=True)
    return gamma[None, :, None, None] * (z - mean) * lax.rsqrt(var + eps) \
        + beta[None, :, None, None]


if __name__ == "__main__":
    # Small deterministic example: N=2, Cin=4, Cout=8, H=W=16, ksize=3, stride=1, dilation=1
    key = jax.random.PRNGKey(0)
    k_x, k_wd, k_bd, k_wp, k_bp = jax.random.split(key, 5)

    N, CIN, COUT, H, W, K = 2, 4, 8, 16, 16, 3

    x = jax.random.normal(k_x, (N, CIN, H, W), jnp.float32)
    w_dw = jax.random.normal(k_wd, (CIN, 1, K, K), jnp.float32) * 0.1
    b_dw = jax.random.normal(k_bd, (CIN,), jnp.float32) * 0.1
    w_pw = jax.random.normal(k_wp, (COUT, CIN, 1, 1), jnp.float32) * 0.1
    b_pw = jax.random.normal(k_bp, (COUT,), jnp.float32) * 0.1
    gamma = jnp.ones((COUT,), jnp.float32)   # BatchNorm2d default init
    beta = jnp.zeros((COUT,), jnp.float32)

    fwd = jax.jit(lambda *a: depthwise_separable_conv(*a, ksize=K, stride=1, dilation=1))
    out = fwd(x, w_dw, b_dw, w_pw, b_pw, gamma, beta)
    out = jax.block_until_ready(out)

    ref = _reference(x, w_dw, b_dw, w_pw, b_pw, gamma, beta)
    assert out.shape == (N, COUT, H, W), out.shape
    assert jnp.allclose(out, ref, rtol=1e-3, atol=1e-3), float(jnp.max(jnp.abs(out - ref)))

    print("KERNEL_OK")
</pallas_src>

<mosaic_0001>
module attributes {stable_mosaic.version = 11 : i64} {
  func.func @_dwpw_stats_kernel(%arg0: i32, %arg1: memref<1x16x16x4xf32, #tpu.memory_space<vmem>>, %arg2: memref<9x4xf32, #tpu.memory_space<vmem>>, %arg3: memref<1x4xf32, #tpu.memory_space<vmem>>, %arg4: memref<4x8xf32, #tpu.memory_space<vmem>>, %arg5: memref<1x8xf32, #tpu.memory_space<vmem>>, %arg6: memref<1x256x8xf32, #tpu.memory_space<vmem>>, %arg7: memref<1x2x8xf32, #tpu.memory_space<vmem>>, %arg8: memref<18x18x4xf32, #tpu.memory_space<vmem>>) attributes {dimension_semantics = [#tpu.dimension_semantics<parallel>], iteration_bounds = array<i64: 2>, scalar_prefetch = 0 : i64, scratch_operands = 1 : i64, tpu.core_type = #tpu.core_type<tc>, window_params = [{transform_indices = @transform_0, window_bounds = array<i64: 1, 16, 16, 4>}, {pipeline_mode = #tpu.pipeline_mode<synchronous>, transform_indices = @transform_1, window_bounds = array<i64: 9, 4>}, {pipeline_mode = #tpu.pipeline_mode<synchronous>, transform_indices = @transform_2, window_bounds = array<i64: 1, 4>}, {pipeline_mode = #tpu.pipeline_mode<synchronous>, transform_indices = @transform_3, window_bounds = array<i64: 4, 8>}, {pipeline_mode = #tpu.pipeline_mode<synchronous>, transform_indices = @transform_4, window_bounds = array<i64: 1, 8>}, {transform_indices = @transform_5, window_bounds = array<i64: 1, 256, 8>}, {transform_indices = @transform_6, window_bounds = array<i64: 1, 2, 8>}]} {
    %cst = arith.constant 0.000000e+00 : f32
    %0 = vector.broadcast %cst : f32 to vector<18x18x4xf32>
    %c0 = arith.constant 0 : index
    %c0_0 = arith.constant 0 : index
    %c0_1 = arith.constant 0 : index
    %1 = vector.load %arg8[%c0, %c0_0, %c0_1] : memref<18x18x4xf32, #tpu.memory_space<vmem>>, vector<18x18x4xf32>
    tpu.vector_store %arg8[%c0, %c0_0, %c0_1], %0 {strides = array<i32>} : memref<18x18x4xf32, #tpu.memory_space<vmem>>, vector<18x18x4xf32>,
    %c0_2 = arith.constant 0 : index
    %c0_3 = arith.constant 0 : index
    %c0_4 = arith.constant 0 : index
    %c0_5 = arith.constant 0 : index
    %2 = vector.load %arg1[%c0_2, %c0_3, %c0_4, %c0_5] : memref<1x16x16x4xf32, #tpu.memory_space<vmem>>, vector<1x16x16x4xf32>
    %3 = vector.shape_cast %2 : vector<1x16x16x4xf32> to vector<16x16x4xf32>
    %c1 = arith.constant 1 : index
    %c1_6 = arith.constant 1 : index
    %c0_7 = arith.constant 0 : index
    %4 = vector.load %arg8[%c1, %c1_6, %c0_7] : memref<18x18x4xf32, #tpu.memory_space<vmem>>, vector<16x16x4xf32>
    tpu.vector_store %arg8[%c1, %c1_6, %c0_7], %3 {strides = array<i32>} : memref<18x18x4xf32, #tpu.memory_space<vmem>>, vector<16x16x4xf32>,
    %c0_8 = arith.constant 0 : index
    %c0_9 = arith.constant 0 : index
    %5 = vector.load %arg2[%c0_8, %c0_9] : memref<9x4xf32, #tpu.memory_space<vmem>>, vector<9x4xf32>
    %cst_10 = arith.constant 0.000000e+00 : f32
    %6 = vector.broadcast %cst_10 : f32 to vector<16x16x4xf32>
    %c0_11 = arith.constant 0 : index
    %c0_12 = arith.constant 0 : index
    %c0_13 = arith.constant 0 : index
    %7 = vector.load %arg8[%c0_11, %c0_12, %c0_13] : memref<18x18x4xf32, #tpu.memory_space<vmem>>, vector<16x16x4xf32>
    %8 = vector.extract_strided_slice %5 {offsets = [0, 0], sizes = [1, 4], strides = [1, 1]} : vector<9x4xf32> to vector<1x4xf32>
    %9 = vector.shape_cast %8 : vector<1x4xf32> to vector<4xf32>
    %10 = vector.shape_cast %9 : vector<4xf32> to vector<1x1x4xf32>
    %11 = vector.broadcast %10 : vector<1x1x4xf32> to vector<16x16x4xf32>
    %12 = arith.mulf %7, %11 : vector<16x16x4xf32>
    %13 = arith.addf %6, %12 : vector<16x16x4xf32>
    %c0_14 = arith.constant 0 : index
    %c1_15 = arith.constant 1 : index
    %c0_16 = arith.constant 0 : index
    %14 = vector.load %arg8[%c0_14, %c1_15, %c0_16] : memref<18x18x4xf32, #tpu.memory_space<vmem>>, vector<16x16x4xf32>
    %15 = vector.extract_strided_slice %5 {offsets = [1, 0], sizes = [1, 4], strides = [1, 1]} : vector<9x4xf32> to vector<1x4xf32>
    %16 = vector.shape_cast %15 : vector<1x4xf32> to vector<4xf32>
    %17 = vector.shape_cast %16 : vector<4xf32> to vector<1x1x4xf32>
    %18 = vector.broadcast %17 : vector<1x1x4xf32> to vector<16x16x4xf32>
    %19 = arith.mulf %14, %18 : vector<16x16x4xf32>
    %20 = arith.addf %13, %19 : vector<16x16x4xf32>
    %c0_17 = arith.constant 0 : index
    %c2 = arith.constant 2 : index
    %c0_18 = arith.constant 0 : index
    %21 = vector.load %arg8[%c0_17, %c2, %c0_18] : memref<18x18x4xf32, #tpu.memory_space<vmem>>, vector<16x16x4xf32>
    %22 = vector.extract_strided_slice %5 {offsets = [2, 0], sizes = [1, 4], strides = [1, 1]} : vector<9x4xf32> to vector<1x4xf32>
    %23 = vector.shape_cast %22 : vector<1x4xf32> to vector<4xf32>
    %24 = vector.shape_cast %23 : vector<4xf32> to vector<1x1x4xf32>
    %25 = vector.broadcast %24 : vector<1x1x4xf32> to vector<16x16x4xf32>
    %26 = arith.mulf %21, %25 : vector<16x16x4xf32>
    %27 = arith.addf %20, %26 : vector<16x16x4xf32>
    %c1_19 = arith.constant 1 : index
    %c0_20 = arith.constant 0 : index
    %c0_21 = arith.constant 0 : index
    %28 = vector.load %arg8[%c1_19, %c0_20, %c0_21] : memref<18x18x4xf32, #tpu.memory_space<vmem>>, vector<16x16x4xf32>
    %29 = vector.extract_strided_slice %5 {offsets = [3, 0], sizes = [1, 4], strides = [1, 1]} : vector<9x4xf32> to vector<1x4xf32>
    %30 = vector.shape_cast %29 : vector<1x4xf32> to vector<4xf32>
    %31 = vector.shape_cast %30 : vector<4xf32> to vector<1x1x4xf32>
    %32 = vector.broadcast %31 : vector<1x1x4xf32> to vector<16x16x4xf32>
    %33 = arith.mulf %28, %32 : vector<16x16x4xf32>
    %34 = arith.addf %27, %33 : vector<16x16x4xf32>
    %c1_22 = arith.constant 1 : index
    %c1_23 = arith.constant 1 : index
    %c0_24 = arith.constant 0 : index
    %35 = vector.load %arg8[%c1_22, %c1_23, %c0_24] : memref<18x18x4xf32, #tpu.memory_space<vmem>>, vector<16x16x4xf32>
    %36 = vector.extract_strided_slice %5 {offsets = [4, 0], sizes = [1, 4], strides = [1, 1]} : vector<9x4xf32> to vector<1x4xf32>
    %37 = vector.shape_cast %36 : vector<1x4xf32> to vector<4xf32>
    %38 = vector.shape_cast %37 : vector<4xf32> to vector<1x1x4xf32>
    %39 = vector.broadcast %38 : vector<1x1x4xf32> to vector<16x16x4xf32>
    %40 = arith.mulf %35, %39 : vector<16x16x4xf32>
    %41 = arith.addf %34, %40 : vector<16x16x4xf32>
    %c1_25 = arith.constant 1 : index
    %c2_26 = arith.constant 2 : index
    %c0_27 = arith.constant 0 : index
    %42 = vector.load %arg8[%c1_25, %c2_26, %c0_27] : memref<18x18x4xf32, #tpu.memory_space<vmem>>, vector<16x16x4xf32>
    %43 = vector.extract_strided_slice %5 {offsets = [5, 0], sizes = [1, 4], strides = [1, 1]} : vector<9x4xf32> to vector<1x4xf32>
    %44 = vector.shape_cast %43 : vector<1x4xf32> to vector<4xf32>
    %45 = vector.shape_cast %44 : vector<4xf32> to vector<1x1x4xf32>
    %46 = vector.broadcast %45 : vector<1x1x4xf32> to vector<16x16x4xf32>
    %47 = arith.mulf %42, %46 : vector<16x16x4xf32>
    %48 = arith.addf %41, %47 : vector<16x16x4xf32>
    %c2_28 = arith.constant 2 : index
    %c0_29 = arith.constant 0 : index
    %c0_30 = arith.constant 0 : index
    %49 = vector.load %arg8[%c2_28, %c0_29, %c0_30] : memref<18x18x4xf32, #tpu.memory_space<vmem>>, vector<16x16x4xf32>
    %50 = vector.extract_strided_slice %5 {offsets = [6, 0], sizes = [1, 4], strides = [1, 1]} : vector<9x4xf32> to vector<1x4xf32>
    %51 = vector.shape_cast %50 : vector<1x4xf32> to vector<4xf32>
    %52 = vector.shape_cast %51 : vector<4xf32> to vector<1x1x4xf32>
    %53 = vector.broadcast %52 : vector<1x1x4xf32> to vector<16x16x4xf32>
    %54 = arith.mulf %49, %53 : vector<16x16x4xf32>
    %55 = arith.addf %48, %54 : vector<16x16x4xf32>
    %c2_31 = arith.constant 2 : index
    %c1_32 = arith.constant 1 : index
    %c0_33 = arith.constant 0 : index
    %56 = vector.load %arg8[%c2_31, %c1_32, %c0_33] : memref<18x18x4xf32, #tpu.memory_space<vmem>>, vector<16x16x4xf32>
    %57 = vector.extract_strided_slice %5 {offsets = [7, 0], sizes = [1, 4], strides = [1, 1]} : vector<9x4xf32> to vector<1x4xf32>
    %58 = vector.shape_cast %57 : vector<1x4xf32> to vector<4xf32>
    %59 = vector.shape_cast %58 : vector<4xf32> to vector<1x1x4xf32>
    %60 = vector.broadcast %59 : vector<1x1x4xf32> to vector<16x16x4xf32>
    %61 = arith.mulf %56, %60 : vector<16x16x4xf32>
    %62 = arith.addf %55, %61 : vector<16x16x4xf32>
    %c2_34 = arith.constant 2 : index
    %c2_35 = arith.constant 2 : index
    %c0_36 = arith.constant 0 : index
    %63 = vector.load %arg8[%c2_34, %c2_35, %c0_36] : memref<18x18x4xf32, #tpu.memory_space<vmem>>, vector<16x16x4xf32>
    %64 = vector.extract_strided_slice %5 {offsets = [8, 0], sizes = [1, 4], strides = [1, 1]} : vector<9x4xf32> to vector<1x4xf32>
    %65 = vector.shape_cast %64 : vector<1x4xf32> to vector<4xf32>
    %66 = vector.shape_cast %65 : vector<4xf32> to vector<1x1x4xf32>
    %67 = vector.broadcast %66 : vector<1x1x4xf32> to vector<16x16x4xf32>
    %68 = arith.mulf %63, %67 : vector<16x16x4xf32>
    %69 = arith.addf %62, %68 : vector<16x16x4xf32>
    %c0_37 = arith.constant 0 : index
    %c0_38 = arith.constant 0 : index
    %70 = vector.load %arg3[%c0_37, %c0_38] : memref<1x4xf32, #tpu.memory_space<vmem>>, vector<1x4xf32>
    %71 = vector.shape_cast %70 : vector<1x4xf32> to vector<4xf32>
    %72 = vector.shape_cast %71 : vector<4xf32> to vector<1x1x4xf32>
    %73 = vector.broadcast %72 : vector<1x1x4xf32> to vector<16x16x4xf32>
    %74 = arith.addf %69, %73 : vector<16x16x4xf32>
    %75 = vector.shape_cast %74 : vector<16x16x4xf32> to vector<256x4xf32>
    %c0_39 = arith.constant 0 : index
    %c0_40 = arith.constant 0 : index
    %76 = vector.load %arg4[%c0_39, %c0_40] : memref<4x8xf32, #tpu.memory_space<vmem>>, vector<4x8xf32>
    %cst_41 = arith.constant dense<0.000000e+00> : vector<256x8xf32>
    %77 = tpu.matmul %75, %76, %cst_41 {dimension_numbers = #tpu.dot_dimension_numbers<[1], [0], [0], [1], [0, 0, 1, 1], [], []>} : vector<256x4xf32>, vector<4x8xf32>, vector<256x8xf32> -> vector<256x8xf32>
    %c0_42 = arith.constant 0 : index
    %c0_43 = arith.constant 0 : index
    %78 = vector.load %arg5[%c0_42, %c0_43] : memref<1x8xf32, #tpu.memory_space<vmem>>, vector<1x8xf32>
    %79 = vector.shape_cast %78 : vector<1x8xf32> to vector<8xf32>
    %80 = vector.shape_cast %79 : vector<8xf32> to vector<1x8xf32>
    %81 = vector.broadcast %80 : vector<1x8xf32> to vector<256x8xf32>
    %82 = arith.addf %77, %81 : vector<256x8xf32>
    %cst_44 = arith.constant dense<0.000000e+00> : vector<8xf32>
    %83 = vector.multi_reduction <add>, %82, %cst_44 [0] : vector<256x8xf32> to vector<8xf32>
    %84 = vector.shape_cast %83 : vector<8xf32> to vector<1x8xf32>
    %c0_45 = arith.constant 0 : index
    %c0_46 = arith.constant 0 : index
    %c0_47 = arith.constant 0 : index
    %85 = vector.load %arg7[%c0_45, %c0_46, %c0_47] : memref<1x2x8xf32, #tpu.memory_space<vmem>>, vector<1x1x8xf32>
    %86 = vector.shape_cast %85 : vector<1x1x8xf32> to vector<1x8xf32>
    %87 = vector.shape_cast %84 : vector<1x8xf32> to vector<1x1x8xf32>
    tpu.vector_store %arg7[%c0_45, %c0_46, %c0_47], %87 {strides = array<i32>} : memref<1x2x8xf32, #tpu.memory_space<vmem>>, vector<1x1x8xf32>,
    %88 = arith.mulf %82, %82 : vector<256x8xf32>
    %cst_48 = arith.constant dense<0.000000e+00> : vector<8xf32>
    %89 = vector.multi_reduction <add>, %88, %cst_48 [0] : vector<256x8xf32> to vector<8xf32>
    %90 = vector.shape_cast %89 : vector<8xf32> to vector<1x8xf32>
    %c0_49 = arith.constant 0 : index
    %c1_50 = arith.constant 1 : index
    %c0_51 = arith.constant 0 : index
    %91 = vector.load %arg7[%c0_49, %c1_50, %c0_51] : memref<1x2x8xf32, #tpu.memory_space<vmem>>, vector<1x1x8xf32>
    %92 = vector.shape_cast %91 : vector<1x1x8xf32> to vector<1x8xf32>
    %93 = vector.shape_cast %90 : vector<1x8xf32> to vector<1x1x8xf32>
    tpu.vector_store %arg7[%c0_49, %c1_50, %c0_51], %93 {strides = array<i32>} : memref<1x2x8xf32, #tpu.memory_space<vmem>>, vector<1x1x8xf32>,
    %c0_52 = arith.constant 0 : index
    %c0_53 = arith.constant 0 : index
    %c0_54 = arith.constant 0 : index
    %94 = vector.load %arg6[%c0_52, %c0_53, %c0_54] : memref<1x256x8xf32, #tpu.memory_space<vmem>>, vector<1x256x8xf32>
    %95 = vector.shape_cast %94 : vector<1x256x8xf32> to vector<256x8xf32>
    %96 = vector.shape_cast %82 : vector<256x8xf32> to vector<1x256x8xf32>
    tpu.vector_store %arg6[%c0_52, %c0_53, %c0_54], %96 {strides = array<i32>} : memref<1x256x8xf32, #tpu.memory_space<vmem>>, vector<1x256x8xf32>,
    return
  }
  func.func @transform_0(%arg0: i32) -> (i32, i32, i32, i32) {
    %c0_i32 = arith.constant 0 : i32
    %c0_i32_0 = arith.constant 0 : i32
    %c0_i32_1 = arith.constant 0 : i32
    %c0_i32_2 = arith.constant 0 : i32
    return %arg0, %c0_i32, %c0_i32_0, %c0_i32_1 : i32, i32, i32, i32
  }
  func.func @transform_1(%arg0: i32) -> (i32, i32) {
    %c0_i32 = arith.constant 0 : i32
    %c0_i32_0 = arith.constant 0 : i32
    %c0_i32_1 = arith.constant 0 : i32
    return %c0_i32, %c0_i32_0 : i32, i32
  }
  func.func @transform_2(%arg0: i32) -> (i32, i32) {
    %c0_i32 = arith.constant 0 : i32
    %c0_i32_0 = arith.constant 0 : i32
    %c0_i32_1 = arith.constant 0 : i32
    return %c0_i32, %c0_i32_0 : i32, i32
  }
  func.func @transform_3(%arg0: i32) -> (i32, i32) {
    %c0_i32 = arith.constant 0 : i32
    %c0_i32_0 = arith.constant 0 : i32
    %c0_i32_1 = arith.constant 0 : i32
    return %c0_i32, %c0_i32_0 : i32, i32
  }
  func.func @transform_4(%arg0: i32) -> (i32, i32) {
    %c0_i32 = arith.constant 0 : i32
    %c0_i32_0 = arith.constant 0 : i32
    %c0_i32_1 = arith.constant 0 : i32
    return %c0_i32, %c0_i32_0 : i32, i32
  }
  func.func @transform_5(%arg0: i32) -> (i32, i32, i32) {
    %c0_i32 = arith.constant 0 : i32
    %c0_i32_0 = arith.constant 0 : i32
    %c0_i32_1 = arith.constant 0 : i32
    return %arg0, %c0_i32, %c0_i32_0 : i32, i32, i32
  }
  func.func @transform_6(%arg0: i32) -> (i32, i32, i32) {
    %c0_i32 = arith.constant 0 : i32
    %c0_i32_0 = arith.constant 0 : i32
    %c0_i32_1 = arith.constant 0 : i32
    return %arg0, %c0_i32, %c0_i32_0 : i32, i32, i32
  }
}

module attributes {stable_mosaic.version = 11 : i64} {
  func.func @_bn_apply_kernel(%arg0: i32, %arg1: i32, %arg2: memref<1x16x128xf32, #tpu.memory_space<vmem>>, %arg3: memref<1x1x128xf32, #tpu.memory_space<vmem>>, %arg4: memref<1x1x128xf32, #tpu.memory_space<vmem>>, %arg5: memref<1x16x128xf32, #tpu.memory_space<vmem>>) attributes {dimension_semantics = [#tpu.dimension_semantics<parallel>, #tpu.dimension_semantics<parallel>], iteration_bounds = array<i64: 2, 1>, scalar_prefetch = 0 : i64, scratch_operands = 0 : i64, tpu.core_type = #tpu.core_type<tc>, window_params = [{transform_indices = @transform_0, window_bounds = array<i64: 1, 16, 128>}, {pipeline_mode = #tpu.pipeline_mode<synchronous>, transform_indices = @transform_1, window_bounds = array<i64: 1, 1, 128>}, {pipeline_mode = #tpu.pipeline_mode<synchronous>, transform_indices = @transform_2, window_bounds = array<i64: 1, 1, 128>}, {transform_indices = @transform_3, window_bounds = array<i64: 1, 16, 128>}]} {
    %c0 = arith.constant 0 : index
    %c0_0 = arith.constant 0 : index
    %c0_1 = arith.constant 0 : index
    %0 = vector.load %arg2[%c0, %c0_0, %c0_1] : memref<1x16x128xf32, #tpu.memory_space<vmem>>, vector<1x16x128xf32>
    %c0_2 = arith.constant 0 : index
    %c0_3 = arith.constant 0 : index
    %c0_4 = arith.constant 0 : index
    %1 = vector.load %arg3[%c0_2, %c0_3, %c0_4] : memref<1x1x128xf32, #tpu.memory_space<vmem>>, vector<1x1x128xf32>
    %2 = vector.broadcast %1 : vector<1x1x128xf32> to vector<1x16x128xf32>
    %3 = arith.mulf %0, %2 : vector<1x16x128xf32>
    %c0_5 = arith.constant 0 : index
    %c0_6 = arith.constant 0 : index
    %c0_7 = arith.constant 0 : index
    %4 = vector.load %arg4[%c0_5, %c0_6, %c0_7] : memref<1x1x128xf32, #tpu.memory_space<vmem>>, vector<1x1x128xf32>
    %5 = vector.broadcast %4 : vector<1x1x128xf32> to vector<1x16x128xf32>
    %6 = arith.addf %3, %5 : vector<1x16x128xf32>
    %c0_8 = arith.constant 0 : index
    %c0_9 = arith.constant 0 : index
    %c0_10 = arith.constant 0 : index
    %7 = vector.load %arg5[%c0_8, %c0_9, %c0_10] : memref<1x16x128xf32, #tpu.memory_space<vmem>>, vector<1x16x128xf32>
    tpu.vector_store %arg5[%c0_8, %c0_9, %c0_10], %6 {strides = array<i32>} : memref<1x16x128xf32, #tpu.memory_space<vmem>>, vector<1x16x128xf32>,
    return
  }
  func.func @transform_0(%arg0: i32, %arg1: i32) -> (i32, i32, i32) {
    %c0_i32 = arith.constant 0 : i32
    %c0_i32_0 = arith.constant 0 : i32
    return %arg0, %arg1, %c0_i32 : i32, i32, i32
  }
  func.func @transform_1(%arg0: i32, %arg1: i32) -> (i32, i32, i32) {
    %c0_i32 = arith.constant 0 : i32
    %c0_i32_0 = arith.constant 0 : i32
    %c0_i32_1 = arith.constant 0 : i32
    %c0_i32_2 = arith.constant 0 : i32
    return %c0_i32, %c0_i32_0, %c0_i32_1 : i32, i32, i32
  }
  func.func @transform_2(%arg0: i32, %arg1: i32) -> (i32, i32, i32) {
    %c0_i32 = arith.constant 0 : i32
    %c0_i32_0 = arith.constant 0 : i32
    %c0_i32_1 = arith.constant 0 : i32
    %c0_i32_2 = arith.constant 0 : i32
    return %c0_i32, %c0_i32_0, %c0_i32_1 : i32, i32, i32
  }
  func.func @transform_3(%arg0: i32, %arg1: i32) -> (i32, i32, i32) {
    %c0_i32 = arith.constant 0 : i32
    %c0_i32_0 = arith.constant 0 : i32
    return %arg0, %arg1, %c0_i32 : i32, i32, i32
  }
}

</mosaic_0001>

<bundles_post_ra>
// kernel: tile.18
= control target key start
LH: loop header
LB: loop body
LE: loop exit
PB: predicated region body
PF: predicated region fallthrough
CT: control target
= control target key end

     0   :  { %s28_s0 = inlined_call_operand.vmem [shape: f32[8], index: 0, kind: input, shape index: {}]   ;;  %s29_s1 = inlined_call_operand.vmem [shape: f32[16,8], index: 1, kind: output, shape index: {}]  }
   0x1   :  { %v4_v0 = vld [vmem:[%s28_s0] ss:$0 sm:$0xff] }
   0x2   :  { %5 = vst [vmem:[%s29_s1] sm:$0xff] %v4_v0 }
   0x3   :  { %8 = vst [vmem:[%s29_s1 + $0x8] sm:$0xff] %v4_v0 }

// kernel: tile.19
= control target key start
LH: loop header
LB: loop body
LE: loop exit
PB: predicated region body
PF: predicated region fallthrough
CT: control target
= control target key end

     0   :  { %s131_s10 = smov 120   ;;  %s132_s11 = smov 104   ;;  %vm3_vm0 = vcmask 64512   ;;  %vm9_vm1 = vcmask 1048512   ;;  %vm15_vm2 = vcmask 982912   ;;  %vm21_vm3 = vcmask 917312   ;;  %s207_s0 = inlined_call_operand.vmem [shape: f32[16,8], index: 0, kind: input, shape index: {}]   ;;  %s208_s1 = inlined_call_operand.vmem [shape: f32[1,1,128], index: 1, kind: output, shape index: {}]  }
   0x1   :  { %v101_v0 = vld [vmem:[%s207_s0 + $0xf] sm:$0x1]   ;;  %v103_v1 = vld [vmem:[%s207_s0 + $0xd] sm:$0x1]   ;;  %v105_v2 = vld [vmem:[%s207_s0 + $0xb] sm:$0x1]  }
   0x2   :  { %7 = vrot.lane.b32.xlu0 %v101_v0, %s131_s10  ;;  %19 = vrot.lane.b32.xlu1 %v103_v1, %s132_s11  ;;  %s133_s14 = smov 88   ;;  %v102_v3 = vld [vmem:[%s207_s0 + $0xe] sm:$0x1]   ;;  %v104_v4 = vld [vmem:[%s207_s0 + $0xc] sm:$0x1]   ;;  %s134_s19 = smov 112  }
   0x3   :  { %31 = vrot.lane.b32.xlu2 %v105_v2, %s133_s14  ;;  %s135_s20 = smov 96   ;;  %v106_v5 = vld [vmem:[%s207_s0 + $0xa] sm:$0x1]   ;;  %s136_s23 = smov 80   ;;  %v107_v6 = vld [vmem:[%s207_s0 + $0x9] sm:$0x1]  }
   0x4   :  { %v108_v7 = vld [vmem:[%s207_s0 + $0x8] sm:$0x1]   ;;  %s137_s28 = smov 72   ;;  %s138_s29 = smov 64   ;;  %v109_v8 = vld [vmem:[%s207_s0 + $0x7] sm:$0x1]  }
   0x5   :  { %s139_s3 = smov 56   ;;  %v110_v9 = vld [vmem:[%s207_s0 + $0x6] sm:$0x1]   ;;  %v111_v10 = vld [vmem:[%s207_s0 + $0x5] sm:$0x1]   ;;  %s140_s8 = smov 48  }
   0x6   :  { %s141_s9 = smov 40   ;;  %v112_v11 = vld [vmem:[%s207_s0 + $0x4] sm:$0x1]   ;;  %s142_s12 = smov 32   ;;  %v113_v12 = vld [vmem:[%s207_s0 + $0x3] sm:$0x1]  }
   0x7   :  { %v114_v13 = vld [vmem:[%s207_s0 + $0x2] sm:$0x1]   ;;  %s143_s17 = smov 24   ;;  %s144_s18 = smov 16   ;;  %v115_v14 = vld [vmem:[%s207_s0 + $0x1] sm:$0x1]  }
   0x8   :  { %s145_s21 = smov 8   ;;  %v2_v15 = vld [vmem:[%s207_s0] sm:$0x1]   ;;  %vm27_vm4 = vcmask 851712   ;;  %vm33_vm5 = vcmask 786112   ;;  %vm39_vm6 = vcmask 720512  }
   0x9   :  { %4 = vst.msk [vmem:[#allocation0] sm:$0x1] %vm3_vm0, %v2_v15   ;;  %vm45_vm7 = vcmask 654912   ;;  %vm51_vm8 = vcmask 589312   ;;  %vm57_vm9 = vcmask 523712   ;;  %vm63_vm10 = vcmask 458112  }
   0xa   :  { %13 = vrot.lane.b32.xlu0 %v102_v3, %s134_s19  ;;  %25 = vrot.lane.b32.xlu1 %v104_v4, %s135_s20  ;;  %vm69_vm11 = vcmask 392512   ;;  %vm75_vm12 = vcmask 326912   ;;  %vm81_vm13 = vcmask 261312   ;;  %vm87_vm14 = vcmask 195712  }
   0xb   :  { %37 = vrot.lane.b32.xlu2 %v106_v5, %s136_s23  ;;  %vm93_vm15 = vcmask 130112  }
  0x12   :  { %43 = vrot.lane.b32.xlu0 %v107_v6, %s137_s28  ;;  %49 = vrot.lane.b32.xlu1 %v108_v7, %s138_s29 }
  0x13   :  { %55 = vrot.lane.b32.xlu2 %v109_v8, %s139_s3 }
  0x1a   :  { %61 = vrot.lane.b32.xlu0 %v110_v9, %s140_s8  ;;  %67 = vrot.lane.b32.xlu1 %v111_v10, %s141_s9 }
  0x1b   :  { %73 = vrot.lane.b32.xlu2 %v112_v11, %s142_s12 }
  0x22   :  { %79 = vrot.lane.b32.xlu0 %v113_v12, %s143_s17  ;;  %85 = vrot.lane.b32.xlu1 %v114_v13, %s144_s18 }
  0x23   :  { %91 = vrot.lane.b32.xlu2 %v115_v14, %s145_s21 }
  0x5d   :  { %v32_v16 = vpop.permute.xlu2 %31  }
  0x65   :  { %v38_v17 = vpop.permute.xlu2 %37  }
  0x6d   :  { %v56_v18 = vpop.permute.xlu2 %55  }
  0x74   :  { %v8_v19 = vpop.permute.xlu0 %7   ;;  %v20_v20 = vpop.permute.xlu1 %19  }
  0x75   :  { %10 = vst.msk [vmem:[#allocation0] sm:$0x1] %vm9_vm1, %v8_v19   ;;  %v74_v21 = vpop.permute.xlu2 %73  }
  0x7c   :  { %v14_v22 = vpop.permute.xlu0 %13   ;;  %v26_v23 = vpop.permute.xlu1 %25  }
  0x7d   :  { %16 = vst.msk [vmem:[#allocation0] sm:$0x1] %vm15_vm2, %v14_v22   ;;  %v92_v24 = vpop.permute.xlu2 %91  }
  0x7e   :  { %22 = vst.msk [vmem:[#allocation0] sm:$0x1] %vm21_vm3, %v20_v20  }
  0x7f   :  { %28 = vst.msk [vmem:[#allocation0] sm:$0x1] %vm27_vm4, %v26_v23  }
  0x80   :  { %34 = vst.msk [vmem:[#allocation0] sm:$0x1] %vm33_vm5, %v32_v16  }
  0x81   :  { %40 = vst.msk [vmem:[#allocation0] sm:$0x1] %vm39_vm6, %v38_v17  }
  0x84   :  { %v44_v25 = vpop.permute.xlu0 %43   ;;  %v50_v26 = vpop.permute.xlu1 %49  }
  0x85   :  { %46 = vst.msk [vmem:[#allocation0] sm:$0x1] %vm45_vm7, %v44_v25  }
  0x86   :  { %52 = vst.msk [vmem:[#allocation0] sm:$0x1] %vm51_vm8, %v50_v26  }
  0x87   :  { %58 = vst.msk [vmem:[#allocation0] sm:$0x1] %vm57_vm9, %v56_v18  }
  0x8c   :  { %v62_v27 = vpop.permute.xlu0 %61   ;;  %v68_v28 = vpop.permute.xlu1 %67  }
  0x8d   :  { %64 = vst.msk [vmem:[#allocation0] sm:$0x1] %vm63_vm10, %v62_v27  }
  0x8e   :  { %70 = vst.msk [vmem:[#allocation0] sm:$0x1] %vm69_vm11, %v68_v28  }
  0x8f   :  { %76 = vst.msk [vmem:[#allocation0] sm:$0x1] %vm75_vm12, %v74_v21  }
  0x94   :  { %v80_v29 = vpop.permute.xlu0 %79   ;;  %v86_v30 = vpop.permute.xlu1 %85  }
  0x95   :  { %82 = vst.msk [vmem:[#allocation0] sm:$0x1] %vm81_vm13, %v80_v29  }
  0x96   :  { %88 = vst.msk [vmem:[#allocation0] sm:$0x1] %vm87_vm14, %v86_v30  }
  0x97   :  { %94 = vst.msk [vmem:[#allocation0] sm:$0x1] %vm93_vm15, %v92_v24  }
  0x9e   :  { %v97_v31 = vld [vmem:[#allocation0] sm:$0x1] }
  0x9f   :  { %100 = vst [vmem:[%s208_s1] sm:$0x1] %v97_v31 }

// kernel: _lambda_.3
= control target key start
LH: loop header
LB: loop body
LE: loop exit
PB: predicated region body
PF: predicated region fallthrough
CT: control target
= control target key end

     0   :  { %s396_s12 = smov 0   ;;  %s398_s13 = smov 0   ;;  %s423_s0 = inlined_call_operand.vmem [shape: f32[2,16,128], index: 0, kind: input, shape index: {}]   ;;  %s424_s1 = inlined_call_operand.vmem [shape: f32[1,1,128], index: 1, kind: input, shape index: {}]   ;;  %s425_s2 = inlined_call_operand.vmem [shape: f32[1,1,128], index: 2, kind: input, shape index: {}]   ;;  %s426_s3 = inlined_call_operand.vmem [shape: f32[2,16,128], index: 3, kind: output, shape index: {}]  }
   0x1   :  { %s400_s14 = smov 0  }
   0x2 LB: > { %s25_s15 = sadd.s32 1, %s370_s13  ;;  %p317_p0 = scmp.ge.s32.totalorder %s374_s14, 1  ;;  %s374_s14 = sphi %s400_s14, %s13_s14   ;;  %s370_s13 = sphi %s398_s13, %s428_s13   ;;  %s366_s12 = sphi %s396_s12, %s427_s12  }
   0x3   : > { %p27_p1 = scmp.ge.s32.totalorder %s25_s15, 2  ;;  %p158_p2 = scmp.lt.s32.totalorder %s374_s14, 3 }
   0x5   : > { %s430_s15 = smov (%p27_p1, %s25_s15), 0  ;;  %p159_p3 = pnand %p317_p0, %p158_p2 }
   0x6   : > { %p191_p4 = scmp.lt.s32.totalorder (!%p159_p3), %s366_s12, 1 }
   0x7   : > { %162 = sbr.rel (%p159_p3) target bundleno = 22 (0x16), region = 32 }
   0xc   : > { %s432_s12 = smov (!%p191_p4, %s366_s12), 1  ;;  %v350_v0 = vld [vmem:[%s424_s1] ss:$0 sm:$0xff] }
   0xd   : > { %s324_s18 = sshll.u32 %s432_s12, 4  ;;  %v351_v1 = vld [vmem:[%s425_s2] ss:$0 sm:$0xff] }
   0xe   : > { %s198_s21 = scalar_lea.vmem %s423_s0, %s324_s18  ;;  %s208_s26 = scalar_lea.vmem %s426_s3, %s324_s18 }
   0xf   : > { %v210_v2 = vld [vmem:[%s198_s21] sm:$0xff]  ;;  %v211_v3 = vld [vmem:[%s198_s21 + $0x8] sm:$0xff] }
  0x10   : > { %v216_v4 = vmul.f32 %v350_v0, %v210_v2  ;;  %v217_v5 = vmul.f32 %v350_v0, %v211_v3 }
  0x12   : > { %v222_v6 = vadd.f32 %v351_v1, %v216_v4  ;;  %v223_v7 = vadd.f32 %v351_v1, %v217_v5 }
  0x14   : > { %224 = vst [vmem:[%s208_s26] sm:$0xff] %v222_v6 }
  0x15   : > { %225 = vst [vmem:[%s208_s26 + $0x8] sm:$0xff] %v223_v7 }
  0x16 PF: > { %s13_s14 = sadd.s32 1, %s374_s14   ;;  %s427_s12 = smov %s370_s13 }
  0x17   : > { %p10_p5 = scmp.ge.s32.totalorder %s13_s14, 4   ;;  %s428_s13 = smov %s430_s15 }
  0x19   :  { %12 = sbr.rel (!%p10_p5) target bundleno = 2 (0x2), region = 62 }

// kernel: _lambda_.2
= control target key start
LH: loop header
LB: loop body
LE: loop exit
PB: predicated region body
PF: predicated region fallthrough
CT: control target
= control target key end

     0   :  { %s1914_s21 = smov 0   ;;  %s3179_s0 = inlined_call_operand.vmem [shape: f32[2,16,16,4], index: 0, kind: input, shape index: {}]   ;;  %s3180_s1 = inlined_call_operand.vmem [shape: f32[9,4], index: 1, kind: input, shape index: {}]   ;;  %s3181_s2 = inlined_call_operand.vmem [shape: f32[1,4], index: 2, kind: input, shape index: {}]   ;;  %s3182_s3 = inlined_call_operand.vmem [shape: f32[4,8], index: 3, kind: input, shape index: {}]   ;;  %s3183_s4 = inlined_call_operand.vmem [shape: f32[1,8], index: 4, kind: input, shape index: {}]   ;;  %s3184_s5 = inlined_call_operand.vmem [shape: f32[2,256,8], index: 5, kind: output, shape index: {0}]   ;;  %s3185_s6 = inlined_call_operand.vmem [shape: f32[2,2,8], index: 6, kind: output, shape index: {1}]  }
   0x1 LB: > { %s1806_s22 = sadd.s32 4294967295, %s1876_s21   ;;  %p1810_p0 = scmp.ge.s32.totalorder %s1876_s21, 1  ;;  %s1876_s21 = sphi %s1914_s21, %s17_s21  }
   0x2   : > { %p215_p1 = scmp.lt.s32.totalorder %s1876_s21, 3 }
   0x4   : > { %p216_p2 = pnand %p1810_p0, %p215_p1 }
   0x6   : > { %219 = sbr.rel (%p216_p2) target bundleno = 386 (0x182), region = 40 }
   0xb   : > { %v1296_v0 = vld [vmem:[%s3182_s3] sm:$0xf]  ;;  %vm1397_vm0 = vcmask 1043456   ;;  %p249_p3 = scmp.lt.s32.totalorder %s1806_s22, 1  ;;  %vm263_vm1 = vcmask 31744   ;;  %v1878_v1 = vmov 0.0  }
   0xc   : > { %1816 = vmatpush.msk.msra.mxu0 %vm1397_vm0, %v1296_v0  ;;  %264 = vst.msk [vmem:[#allocation2] sm:$0xff] %vm263_vm1, %v1878_v1  ;;  %1853 = vmatpush.msk.msra.mxu1 %vm1397_vm0, %v1296_v0  ;;  %vm266_vm2 = vcmask 25600   ;;  %v384_v2 = vld [vmem:[%s3180_s1] sm:$0xff]  ;;  %v2021_v39 = vld [vmem:[%s3180_s1 + $0x8] ss:$0 sm:$0xff]  ;;  %vm1514_vm3 = vcmask 64512  }
   0xd   : > { %s3322_s22 = smov (!%p249_p3, %s1806_s22), 1  ;;  %265 = vst.msk [vmem:[#allocation2 + $0x8] sm:$0xff] %vm263_vm1, %v1878_v1  ;;  %1854 = vmatpush.msk.msra.mxu2 %vm1397_vm0, %v1296_v0  ;;  %1855 = vmatpush.msk.msra.mxu3 %vm1397_vm0, %v1296_v0  ;;  %v1948_v3 = vperm.slane %v384_v2, 0  ;;  %v1953_v5 = vperm.slane %v384_v2, 1  ;;  %v1958_v7 = vperm.slane %v384_v2, 2  ;;  %v1971_v17 = vperm.slane %v384_v2, 3 }
   0xe   : > { %268 = vst.msk [vmem:[#allocation2 + $0x18] sm:$0xff] %vm263_vm1, %v1878_v1  ;;  %s1851_s27 = sshll.u32 %s3322_s22, 8  ;;  %v1973_v18 = vperm.slane %v384_v2, 4  ;;  %v1979_v20 = vperm.slane %v384_v2, 5  ;;  %v1995_v27 = vperm.slane %v384_v2, 6  ;;  %v2005_v31 = vperm.slane %v384_v2, 7 }
   0xf   : > { %269 = vst.msk [vmem:[#allocation2 + $0x20] sm:$0xff] %vm263_vm1, %v1878_v1  ;;  %s1944_s30 = scalar_lea.vmem %s3179_s0, %s1851_s27  ;;  %v2051_v55 = vld [vmem:[%s3181_s2] ss:$0 sm:$0xff]  ;;  %s2937_s19 = scalar_lea.vmem %s3184_s5, %s1851_s27  ;;  %vm1584_vm4 = vcmask 57344  }
  0x10   : > { %270 = vst.msk [vmem:[#allocation2 + $0x28] sm:$0x3] %vm266_vm2, %v1878_v1  ;;  %v319_v4 = vld [vmem:[%s1944_s30] sm:$0xff]  ;;  %v320_v6 = vld [vmem:[%s1944_s30 + $0x8] sm:$0xff]  ;;  %v321_v8 = vld [vmem:[%s1944_s30 + $0x10] sm:$0xff]  ;;  %s1815_s20 = sshll.u32 %s3322_s22, 1 }
  0x11   : > { %271 = vst.msk [vmem:[#allocation2 + $0x30] sm:$0xff] %vm263_vm1, %v1878_v1  ;;  %v322_v10 = vld [vmem:[%s1944_s30 + $0x18] sm:$0xff]  ;;  %s262_s25 = scalar_lea.vmem %s3185_s6, %s1815_s20 }
  0x12   : > { %272 = vst.msk [vmem:[#allocation2 + $0x38] sm:$0xff] %vm263_vm1, %v1878_v1 }
  0x13   : > { %273 = vst.msk [vmem:[#allocation2 + $0x40] sm:$0x3] %vm266_vm2, %v1878_v1  ;;  %v386_v9 = vld [vmem:[#allocation2] sm:$0xff] }
  0x14   : > { %352 = vst.msk [vmem:[#allocation2 + $0x19] sm:$0xff] %vm263_vm1, %v319_v4  ;;  %v419_v11 = vmul.f32 %v1948_v3, %v386_v9  ;;  %v483_v12 = vld [vmem:[#allocation2 + $0x1] sm:$0xff] }
  0x15   : > { %v580_v13 = vld [vmem:[#allocation2 + $0x2] sm:$0xff]  ;;  %353 = vst.msk [vmem:[#allocation2 + $0x21] sm:$0xff] %vm263_vm1, %v320_v6  ;;  %v516_v14 = vmul.f32 %v1953_v5, %v483_v12 }
  0x16   : > { %354 = vst.msk [vmem:[#allocation2 + $0x31] sm:$0xff] %vm263_vm1, %v321_v8  ;;  %v613_v15 = vmul.f32 %v1958_v7, %v580_v13  ;;  %v387_v23 = vld [vmem:[#allocation2 + $0x8] sm:$0xff] }
  0x17   : > { %355 = vst.msk [vmem:[#allocation2 + $0x39] sm:$0xff] %vm263_vm1, %v322_v10  ;;  %v548_v16 = vadd.f32 %v516_v14, %v419_v11  ;;  %v420_v32 = vmul.f32 %v1948_v3, %v387_v23 }
  0x18   : > { %267 = vst.msk [vmem:[#allocation2 + $0x10] sm:$0x3] %vm266_vm2, %v1878_v1 }
  0x19   : > { %274 = vst.msk [vmem:[#allocation2 + $0x48] sm:$0xff] %vm263_vm1, %v1878_v1  ;;  %v645_v19 = vadd.f32 %v613_v15, %v548_v16 }
  0x1a   : > { %275 = vst.msk [vmem:[#allocation2 + $0x50] sm:$0xff] %vm263_vm1, %v1878_v1 }
  0x1b   : > { %v1983_v21 = vld [vmem:[#allocation2 + $0x18] sm:$0xff]  ;;  %276 = vst.msk [vmem:[#allocation2 + $0x58] sm:$0x3] %vm266_vm2, %v1878_v1 }
  0x1c   : > { %v1985_v22 = vld [vmem:[#allocation2 + $0x19] sm:$0xff]  ;;  %v710_v24 = vmul.f32 %v1971_v17, %v1983_v21  ;;  %277 = vst.msk [vmem:[#allocation2 + $0x60] sm:$0xff] %vm263_vm1, %v1878_v1  ;;  %v775_v43 = vld [vmem:[#allocation2 + $0x21] sm:$0xff]  ;;  %v421_v11 = vmul.f32 %v1983_v21, %v1948_v3 }
  0x1d   : > { %v807_v25 = vmul.f32 %v1973_v18, %v1985_v22  ;;  %v1993_v26 = vld [vmem:[#allocation2 + $0x1a] sm:$0xff]  ;;  %v1999_v28 = vld [vmem:[#allocation2 + $0x30] sm:$0xff]  ;;  %278 = vst.msk [vmem:[#allocation2 + $0x68] sm:$0xff] %vm263_vm1, %v1878_v1  ;;  %v872_v48 = vld [vmem:[#allocation2 + $0x22] sm:$0xff]  ;;  %v808_v52 = vmul.f32 %v1973_v18, %v775_v43  ;;  %v518_v12 = vmul.f32 %v1985_v22, %v1953_v5  ;;  %v519_v14 = vmul.f32 %v775_v43, %v1953_v5 }
  0x1e   : > { %v742_v29 = vadd.f32 %v710_v24, %v645_v19  ;;  %v904_v30 = vmul.f32 %v1979_v20, %v1993_v26  ;;  %279 = vst.msk [vmem:[#allocation2 + $0x70] sm:$0x3] %vm266_vm2, %v1878_v1  ;;  %v2010_v33 = vld [vmem:[#allocation2 + $0x20] sm:$0xff]  ;;  %v2012_v34 = vld [vmem:[#allocation2 + $0x31] sm:$0xff]  ;;  %v1002_v38 = vmul.f32 %v1995_v27, %v1999_v28  ;;  %v905_v57 = vmul.f32 %v1979_v20, %v872_v48 }
  0x1f   : > { %280 = vst.msk [vmem:[#allocation2 + $0x78] sm:$0xff] %vm263_vm1, %v1878_v1  ;;  %v484_v35 = vld [vmem:[#allocation2 + $0x9] sm:$0xff]  ;;  %v2027_v42 = vld [vmem:[#allocation2 + $0x32] sm:$0xff]  ;;  %v1099_v45 = vmul.f32 %v2005_v31, %v2012_v34  ;;  %v711_v47 = vmul.f32 %v1971_v17, %v2010_v33  ;;  %v2066_v62 = vld [vmem:[#allocation2 + $0x3a] sm:$0xff]  ;;  %v422_v13 = vmul.f32 %v2010_v33, %v1948_v3  ;;  %v550_v15 = vadd.f32 %v518_v12, %v421_v11 }
  0x20   : > { %v581_v36 = vld [vmem:[#allocation2 + $0xa] sm:$0xff]  ;;  %v839_v37 = vadd.f32 %v807_v25, %v742_v29  ;;  %281 = vst.msk [vmem:[#allocation2 + $0x80] sm:$0xff] %vm263_vm1, %v1878_v1  ;;  %v517_v40 = vmul.f32 %v1953_v5, %v484_v35  ;;  %v1196_v50 = vmul.f32 %v2021_v39, %v2027_v42  ;;  %v2046_v53 = vld [vmem:[#allocation2 + $0x38] sm:$0xff]  ;;  %v1197_v6 = vmul.f32 %v2021_v39, %v2066_v62 }
  0x21   : > { %v614_v41 = vmul.f32 %v1958_v7, %v581_v36  ;;  %282 = vst.msk [vmem:[#allocation2 + $0x88] sm:$0x3] %vm266_vm2, %v1878_v1  ;;  %v2058_v58 = vld [vmem:[#allocation2 + $0x39] sm:$0xff]  ;;  %v1003_v61 = vmul.f32 %v1995_v27, %v2046_v53  ;;  %v615_v16 = vmul.f32 %v1993_v26, %v1958_v7  ;;  %v551_v19 = vadd.f32 %v519_v14, %v422_v13  ;;  %v324_v29 = vld [vmem:[%s1944_s30 + $0x28] sm:$0xff]  ;;  %v325_v33 = vld [vmem:[%s1944_s30 + $0x30] sm:$0xff] }
  0x22   : > { %v936_v44 = vadd.f32 %v904_v30, %v839_v37  ;;  %283 = vst.msk [vmem:[#allocation2 + $0x90] sm:$0xff] %vm263_vm1, %v1878_v1  ;;  %v549_v46 = vadd.f32 %v517_v40, %v420_v32  ;;  %v1100_v2 = vmul.f32 %v2005_v31, %v2058_v58  ;;  %v616_v21 = vmul.f32 %v872_v48, %v1958_v7  ;;  %v323_v26 = vld [vmem:[%s1944_s30 + $0x20] sm:$0xff]  ;;  %v326_v37 = vld [vmem:[%s1944_s30 + $0x38] sm:$0xff] }
  0x23   : > { %284 = vst.msk [vmem:[#allocation2 + $0x98] sm:$0xff] %vm263_vm1, %v1878_v1  ;;  %v647_v22 = vadd.f32 %v615_v16, %v550_v15  ;;  %v712_v23 = vmul.f32 %v1999_v28, %v1971_v17  ;;  %v713_v25 = vmul.f32 %v2046_v53, %v1971_v17  ;;  %v809_v32 = vmul.f32 %v2012_v34, %v1973_v18 }
  0x24   : > { %v1034_v49 = vadd.f32 %v1002_v38, %v936_v44  ;;  %285 = vst.msk [vmem:[#allocation2 + $0xa0] sm:$0x3] %vm266_vm2, %v1878_v1  ;;  %v646_v51 = vadd.f32 %v614_v41, %v549_v46  ;;  %v648_v24 = vadd.f32 %v616_v21, %v551_v19  ;;  %v810_v36 = vmul.f32 %v2058_v58, %v1973_v18  ;;  %v327_v38 = vld [vmem:[%s1944_s30 + $0x40] sm:$0xff]  ;;  %v328_v44 = vld [vmem:[%s1944_s30 + $0x48] sm:$0xff] }
  0x25   : > { %286 = vst.msk [vmem:[#allocation2 + $0xa8] sm:$0xff] %vm263_vm1, %v1878_v1  ;;  %v744_v30 = vadd.f32 %v712_v23, %v647_v22  ;;  %v423_v40 = vmul.f32 %v1999_v28, %v1948_v3  ;;  %v520_v41 = vmul.f32 %v2012_v34, %v1953_v5  ;;  %v906_v43 = vmul.f32 %v2027_v42, %v1979_v20 }
  0x26   : > { %v1131_v54 = vadd.f32 %v1099_v45, %v1034_v49  ;;  %287 = vst.msk [vmem:[#allocation2 + $0xb0] sm:$0xff] %vm263_vm1, %v1878_v1  ;;  %v743_v56 = vadd.f32 %v711_v47, %v646_v51  ;;  %v745_v35 = vadd.f32 %v713_v25, %v648_v24  ;;  %v329_v45 = vld [vmem:[%s1944_s30 + $0x50] sm:$0xff]  ;;  %v907_v28 = vmul.f32 %v2066_v62, %v1979_v20  ;;  %v330_v47 = vld [vmem:[%s1944_s30 + $0x58] sm:$0xff] }
  0x27   : > { %288 = vst.msk [vmem:[#allocation2 + $0xb8] sm:$0x3] %vm266_vm2, %v1878_v1  ;;  %v424_v34 = vmul.f32 %v2046_v53, %v1948_v3  ;;  %v521_v48 = vmul.f32 %v2058_v58, %v1953_v5  ;;  %v333_v49 = vld [vmem:[%s1944_s30 + $0x70] sm:$0xff]  ;;  %v617_v51 = vmul.f32 %v2027_v42, %v1958_v7 }
  0x28   : > { %v1228_v59 = vadd.f32 %v1196_v50, %v1131_v54  ;;  %289 = vst.msk [vmem:[#allocation2 + $0xc0] sm:$0xff] %vm263_vm1, %v1878_v1  ;;  %v840_v60 = vadd.f32 %v808_v52, %v743_v56  ;;  %v842_v46 = vadd.f32 %v810_v36, %v745_v35  ;;  %v552_v50 = vadd.f32 %v520_v41, %v423_v40  ;;  %v334_v54 = vld [vmem:[%s1944_s30 + $0x78] sm:$0xff]  ;;  %v335_v56 = vld [vmem:[%s1944_s30 + $0x80] sm:$0xff] }
  0x29   : > { %290 = vst.msk [vmem:[#allocation2 + $0xc8] sm:$0xff] %vm263_vm1, %v1878_v1 }
  0x2a   : > { %v1264_v63 = vadd.f32 %v2051_v55, %v1228_v59  ;;  %291 = vst.msk [vmem:[#allocation2 + $0xd0] sm:$0x3] %vm266_vm2, %v1878_v1  ;;  %v937_v0 = vadd.f32 %v905_v57, %v840_v60  ;;  %v336_v57 = vld [vmem:[%s1944_s30 + $0x88] sm:$0xff]  ;;  %v939_v58 = vadd.f32 %v907_v28, %v842_v46  ;;  %v337_v60 = vld [vmem:[%s1944_s30 + $0x90] sm:$0xff]  ;;  %v2216_v15 = vadd.f32 %v617_v51, %v552_v50 }
  0x2b   : > { %292 = vst.msk [vmem:[#allocation2 + $0xd8] sm:$0xff] %vm263_vm1, %v1878_v1 }
  0x2c   : > { %1817 = vmatmul.msk.f32.vlgmr.msra.gmra.mxu0 %vm263_vm1, %v1264_v63  ;;  %293 = vst.msk [vmem:[#allocation2 + $0xe0] sm:$0xff] %vm263_vm1, %v1878_v1  ;;  %v1035_v4 = vadd.f32 %v1003_v61, %v937_v0 }
  0x2d   : > { %294 = vst.msk [vmem:[#allocation2 + $0xe8] sm:$0x3] %vm266_vm2, %v1878_v1 }
  0x2e   : > { %295 = vst.msk [vmem:[#allocation2 + $0xf0] sm:$0xff] %vm263_vm1, %v1878_v1  ;;  %v1132_v8 = vadd.f32 %v1100_v2, %v1035_v4  ;;  %v338_v4 = vld [vmem:[%s1944_s30 + $0x98] sm:$0xff] }
  0x2f   : > { %296 = vst.msk [vmem:[#allocation2 + $0xf8] sm:$0xff] %vm263_vm1, %v1878_v1 }
  0x30   : > { %297 = vst.msk [vmem:[#allocation2 + $0x100] sm:$0x3] %vm266_vm2, %v1878_v1  ;;  %v1229_v9 = vadd.f32 %v1197_v6, %v1132_v8  ;;  %v553_v6 = vadd.f32 %v521_v48, %v424_v34  ;;  %v618_v8 = vmul.f32 %v2066_v62, %v1958_v7  ;;  %v331_v62 = vld [vmem:[%s1944_s30 + $0x60] sm:$0xff] }
  0x31   : > { %298 = vst.msk [vmem:[#allocation2 + $0x108] sm:$0xff] %vm263_vm1, %v1878_v1 }
  0x32   : > { %299 = vst.msk [vmem:[#allocation2 + $0x110] sm:$0xff] %vm263_vm1, %v1878_v1  ;;  %v1265_v10 = vadd.f32 %v2051_v55, %v1229_v9 }
  0x33   : > { %300 = vst.msk [vmem:[#allocation2 + $0x118] sm:$0x3] %vm266_vm2, %v1878_v1 }
  0x34   : > { %301 = vst.msk [vmem:[#allocation2 + $0x120] sm:$0xff] %vm263_vm1, %v1878_v1  ;;  %1818 = vmatmul.msk.f32.gmra.mxu0 %vm263_vm1, %v1265_v10 }
  0x35   : > { %302 = vst.msk [vmem:[#allocation2 + $0x128] sm:$0xff] %vm263_vm1, %v1878_v1 }
  0x36   : > { %303 = vst.msk [vmem:[#allocation2 + $0x130] sm:$0x3] %vm266_vm2, %v1878_v1 }
  0x37   : > { %304 = vst.msk [vmem:[#allocation2 + $0x138] sm:$0xff] %vm263_vm1, %v1878_v1 }
  0x38   : > { %305 = vst.msk [vmem:[#allocation2 + $0x140] sm:$0xff] %vm263_vm1, %v1878_v1 }
  0x39   : > { %306 = vst.msk [vmem:[#allocation2 + $0x148] sm:$0x3] %vm266_vm2, %v1878_v1 }
  0x3a   : > { %307 = vst.msk [vmem:[#allocation2 + $0x150] sm:$0xff] %vm263_vm1, %v1878_v1 }
  0x3b   : > { %308 = vst.msk [vmem:[#allocation2 + $0x158] sm:$0xff] %vm263_vm1, %v1878_v1 }
  0x3c   : > { %309 = vst.msk [vmem:[#allocation2 + $0x160] sm:$0x3] %vm266_vm2, %v1878_v1 }
  0x3d   : > { %310 = vst.msk [vmem:[#allocation2 + $0x168] sm:$0xff] %vm263_vm1, %v1878_v1 }
  0x3e   : > { %311 = vst.msk [vmem:[#allocation2 + $0x170] sm:$0xff] %vm263_vm1, %v1878_v1 }
  0x3f   : > { %312 = vst.msk [vmem:[#allocation2 + $0x178] sm:$0x3] %vm266_vm2, %v1878_v1 }
  0x40   : > { %313 = vst.msk [vmem:[#allocation2 + $0x180] sm:$0xff] %vm263_vm1, %v1878_v1 }
  0x41   : > { %314 = vst.msk [vmem:[#allocation2 + $0x188] sm:$0xff] %vm263_vm1, %v1878_v1 }
  0x42   : > { %315 = vst.msk [vmem:[#allocation2 + $0x190] sm:$0x3] %vm266_vm2, %v1878_v1 }
  0x43   : > { %316 = vst.msk [vmem:[#allocation2 + $0x198] sm:$0xff] %vm263_vm1, %v1878_v1 }
  0x44   : > { %317 = vst.msk [vmem:[#allocation2 + $0x1a0] sm:$0xff] %vm263_vm1, %v1878_v1 }
  0x45   : > { %318 = vst.msk [vmem:[#allocation2 + $0x1a8] sm:$0x3] %vm266_vm2, %v1878_v1  ;;  %v841_v1 = vadd.f32 %v809_v32, %v744_v30 }
  0x46   : > { %356 = vst.msk [vmem:[#allocation2 + $0x49] sm:$0xff] %vm263_vm1, %v323_v26 }
  0x47   : > { %357 = vst.msk [vmem:[#allocation2 + $0x51] sm:$0xff] %vm263_vm1, %v324_v29  ;;  %v938_v52 = vadd.f32 %v906_v43, %v841_v1  ;;  %v332_v1 = vld [vmem:[%s1944_s30 + $0x68] sm:$0xff]  ;;  %v2251_v43 = vadd.f32 %v618_v8, %v553_v6 }
  0x48   : > { %358 = vst.msk [vmem:[#allocation2 + $0x61] sm:$0xff] %vm263_vm1, %v325_v33 }
  0x49   : > { %359 = vst.msk [vmem:[#allocation2 + $0x69] sm:$0xff] %vm263_vm1, %v326_v37 }
  0x4a   : > { %360 = vst.msk [vmem:[#allocation2 + $0x79] sm:$0xff] %vm263_vm1, %v327_v38 }
  0x4b   : > { %361 = vst.msk [vmem:[#allocation2 + $0x81] sm:$0xff] %vm263_vm1, %v328_v44  ;;  %v341_v44 = vld [vmem:[%s1944_s30 + $0xb0] sm:$0xff] }
  0x4c   : > { %362 = vst.msk [vmem:[#allocation2 + $0x91] sm:$0xff] %vm263_vm1, %v329_v45 }
  0x4d   : > { %v2183_v59 = vld [vmem:[#allocation2 + $0x48] sm:$0xff]  ;;  %363 = vst.msk [vmem:[#allocation2 + $0x99] sm:$0xff] %vm263_vm1, %v330_v47 }
  0x4e   : > { %v2185_v53 = vld [vmem:[#allocation2 + $0x49] sm:$0xff]  ;;  %v1004_v61 = vmul.f32 %v1995_v27, %v2183_v59  ;;  %v2197_v2 = vld [vmem:[#allocation2 + $0x51] sm:$0xff]  ;;  %366 = vst.msk [vmem:[#allocation2 + $0xc1] sm:$0xff] %vm263_vm1, %v333_v49  ;;  %v714_v48 = vmul.f32 %v2183_v59, %v1971_v17 }
  0x4f   : > { %3243 = vst [vmem:[#allocation3_spill] sm:$0xff] %v2185_v53  ;;  %v1101_v42 = vmul.f32 %v2005_v31, %v2185_v53  ;;  %v2193_v63 = vld [vmem:[#allocation2 + $0x4a] sm:$0xff]  ;;  %v2205_v10 = vld [vmem:[#allocation2 + $0x60] sm:$0xff]  ;;  %v1102_v13 = vmul.f32 %v2005_v31, %v2197_v2  ;;  %v2213_v14 = vld [vmem:[#allocation2 + $0x52] sm:$0xff] }
  0x50   : > { %3244 = vst [vmem:[#allocation4_spill] sm:$0xff] %v2193_v63  ;;  %v2195_v0 = vld [vmem:[#allocation2 + $0x50] sm:$0xff]  ;;  %v1198_v9 = vmul.f32 %v2021_v39, %v2193_v63  ;;  %v2207_v11 = vld [vmem:[#allocation2 + $0x61] sm:$0xff]  ;;  %v1036_v16 = vadd.f32 %v1004_v61, %v938_v52  ;;  %v427_v19 = vmul.f32 %v1948_v3, %v2205_v10  ;;  %v1199_v23 = vmul.f32 %v2021_v39, %v2213_v14  ;;  %v342_v49 = vld [vmem:[%s1944_s30 + $0xb8] sm:$0xff] }
  0x51   : > { %v1005_v12 = vmul.f32 %v1995_v27, %v2195_v0  ;;  %367 = vst.msk [vmem:[#allocation2 + $0xc9] sm:$0xff] %vm263_vm1, %v334_v54  ;;  %v524_v21 = vmul.f32 %v1953_v5, %v2207_v11  ;;  %v2223_v22 = vld [vmem:[#allocation2 + $0x62] sm:$0xff]  ;;  %v2234_v29 = vld [vmem:[#allocation2 + $0x78] sm:$0xff]  ;;  %v2242_v36 = vld [vmem:[#allocation2 + $0x6a] sm:$0xff] }
  0x52   : > { %3245 = vst [vmem:[#allocation5_spill] sm:$0xff] %v2223_v22  ;;  %v2227_v24 = vld [vmem:[#allocation2 + $0x68] sm:$0xff]  ;;  %v621_v26 = vmul.f32 %v1958_v7, %v2223_v22  ;;  %v2236_v30 = vld [vmem:[#allocation2 + $0x79] sm:$0xff]  ;;  %v1133_v37 = vadd.f32 %v1101_v42, %v1036_v16  ;;  %v718_v40 = vmul.f32 %v1971_v17, %v2234_v29  ;;  %v622_v47 = vmul.f32 %v1958_v7, %v2242_v36 }
  0x53   : > { %v2229_v25 = vld [vmem:[#allocation2 + $0x69] sm:$0xff]  ;;  %368 = vst.msk [vmem:[#allocation2 + $0xd9] sm:$0xff] %vm263_vm1, %v335_v56  ;;  %v1037_v32 = vadd.f32 %v1005_v12, %v939_v58  ;;  %v428_v33 = vmul.f32 %v1948_v3, %v2227_v24  ;;  %v556_v38 = vadd.f32 %v524_v21, %v427_v19  ;;  %v2247_v41 = vld [vmem:[#allocation2 + $0x80] sm:$0xff]  ;;  %v815_v52 = vmul.f32 %v1973_v18, %v2236_v30  ;;  %v2268_v56 = vld [vmem:[#allocation2 + $0x91] sm:$0xff] }
  0x54   : > { %3246 = vst [vmem:[#allocation6_spill] sm:$0xff] %v2234_v29  ;;  %v525_v35 = vmul.f32 %v1953_v5, %v2229_v25  ;;  %v2254_v45 = vld [vmem:[#allocation2 + $0x7a] sm:$0xff]  ;;  %v1230_v50 = vadd.f32 %v1198_v9, %v1133_v37  ;;  %v2266_v54 = vld [vmem:[#allocation2 + $0x90] sm:$0xff]  ;;  %v811_v58 = vmul.f32 %v2185_v53, %v1973_v18  ;;  %v908_v9 = vmul.f32 %v2193_v63, %v1979_v20 }
  0x55   : > { %3247 = vst [vmem:[#allocation7_spill] sm:$0xff] %v2236_v30  ;;  %v1134_v46 = vadd.f32 %v1102_v13, %v1037_v32  ;;  %v2258_v34 = vld [vmem:[#allocation2 + $0x81] sm:$0xff]  ;;  %v653_v51 = vadd.f32 %v621_v26, %v556_v38  ;;  %v2291_v19 = vld [vmem:[#allocation2 + $0x98] sm:$0xff]  ;;  %v1010_v26 = vmul.f32 %v1995_v27, %v2266_v54  ;;  %v1107_v32 = vmul.f32 %v2005_v31, %v2268_v56 }
  0x56   : > { %369 = vst.msk [vmem:[#allocation2 + $0xe1] sm:$0xff] %vm263_vm1, %v336_v57  ;;  %v557_v28 = vadd.f32 %v525_v35, %v428_v33  ;;  %v2270_v57 = vld [vmem:[#allocation2 + $0x82] sm:$0xff]  ;;  %v1266_v12 = vadd.f32 %v2051_v55, %v1230_v50  ;;  %v816_v16 = vmul.f32 %v1973_v18, %v2258_v34  ;;  %v2303_v37 = vld [vmem:[#allocation2 + $0x99] sm:$0xff]  ;;  %v1006_v63 = vmul.f32 %v1995_v27, %v2205_v10 }
  0x57   : > { %370 = vst.msk [vmem:[#allocation2 + $0xf1] sm:$0xff] %vm263_vm1, %v337_v60  ;;  %v2275_v60 = vld [vmem:[#allocation2 + $0x92] sm:$0xff]  ;;  %v1231_v61 = vadd.f32 %v1199_v23, %v1134_v46  ;;  %v2279_v6 = vld [vmem:[#allocation2 + $0xc0] sm:$0xff]  ;;  %v750_v13 = vadd.f32 %v718_v40, %v653_v51  ;;  %v913_v35 = vmul.f32 %v1979_v20, %v2270_v57  ;;  %v526_v53 = vmul.f32 %v2236_v30, %v1953_v5 }
  0x58   : > { %3248 = vst [vmem:[#allocation8_spill] sm:$0xff] %v2254_v45  ;;  %v654_v42 = vadd.f32 %v622_v47, %v557_v28  ;;  %v2281_v8 = vld [vmem:[#allocation2 + $0xc1] sm:$0xff]  ;;  %1819 = vmatmul.msk.f32.gmra.mxu0 %vm263_vm1, %v1266_v12  ;;  %v435_v46 = vmul.f32 %v1948_v3, %v2279_v6 }
  0x59   : > { %3249 = vst [vmem:[#allocation9_spill] sm:$0xff] %v2258_v34  ;;  %v2293_v21 = vld [vmem:[#allocation2 + $0xc2] sm:$0xff]  ;;  %v847_v40 = vadd.f32 %v815_v52, %v750_v13  ;;  %v532_v28 = vmul.f32 %v1953_v5, %v2281_v8  ;;  %v1267_v50 = vadd.f32 %v2051_v55, %v1231_v61  ;;  %v1108_v13 = vmul.f32 %v2005_v31, %v2303_v37 }
  0x5a   : > { %371 = vst.msk [vmem:[#allocation2 + $0xf9] sm:$0xff] %vm263_vm1, %v338_v4  ;;  %v719_v4 = vmul.f32 %v1971_v17, %v2247_v41  ;;  %v343_v23 = vld [vmem:[%s1944_s30 + $0xc0] sm:$0xff]  ;;  %v2305_v38 = vld [vmem:[#allocation2 + $0xd8] sm:$0xff]  ;;  %v629_v52 = vmul.f32 %v1958_v7, %v2293_v21  ;;  %v2367_v30 = vld [vmem:[#allocation2 + $0xc8] sm:$0xff] }
  0x5b   : > { %3250 = vst [vmem:[#allocation10_spill] sm:$0xff] %v2266_v54  ;;  %v2317_v47 = vld [vmem:[#allocation2 + $0xd9] sm:$0xff]  ;;  %v726_v61 = vmul.f32 %v1971_v17, %v2305_v38 }
  0x5c   : > { %3251 = vst [vmem:[#allocation11_spill] sm:$0xff] %v2268_v56  ;;  %v751_v33 = vadd.f32 %v719_v4, %v654_v42 }
  0x5d   : > { %3252 = vst [vmem:[#allocation12_spill] sm:$0xff] %v2270_v57  ;;  %v2324_v42 = vld [vmem:[#allocation2 + $0xda] sm:$0xff] }
  0x5e   : > { %364 = vst.msk [vmem:[#allocation2 + $0xa9] sm:$0xff] %vm263_vm1, %v331_v62  ;;  %v912_v62 = vmul.f32 %v1979_v20, %v2254_v45  ;;  %v848_v51 = vadd.f32 %v816_v16, %v751_v33  ;;  %v2326_v4 = vld [vmem:[#allocation2 + $0xf0] sm:$0xff] }
  0x5f   : > { %3253 = vst [vmem:[#allocation13_spill] sm:$0xff] %v2279_v6  ;;  %v746_v6 = vadd.f32 %v714_v48, %v2216_v15  ;;  %v429_v15 = vmul.f32 %v2234_v29, %v1948_v3  ;;  %v339_v48 = vld [vmem:[%s1944_s30 + $0xa0] sm:$0xff] }
  0x60   : > { %3254 = vst [vmem:[#allocation14_spill] sm:$0xff] %v2281_v8  ;;  %v944_v12 = vadd.f32 %v912_v62, %v847_v40  ;;  %v564_v8 = vadd.f32 %v532_v28, %v435_v46  ;;  %v945_v16 = vadd.f32 %v913_v35, %v848_v51  ;;  %v920_v40 = vmul.f32 %v1979_v20, %v2324_v42  ;;  %v2342_v28 = vld [vmem:[#allocation2 + $0xf1] sm:$0xff] }
  0x61   : > { %365 = vst.msk [vmem:[#allocation2 + $0xb1] sm:$0xff] %vm263_vm1, %v332_v1  ;;  %v1204_v1 = vmul.f32 %v2021_v39, %v2275_v60  ;;  %v1018_v46 = vmul.f32 %v1995_v27, %v2326_v4  ;;  %v843_v51 = vadd.f32 %v811_v58, %v746_v6  ;;  %v344_v58 = vld [vmem:[%s1944_s30 + $0xc8] sm:$0xff]  ;;  %1820 = vmatmul.msk.f32.gmra.mxu0 %vm263_vm1, %v1267_v50 }
  0x62   : > { %3255 = vst [vmem:[#allocation15_spill] sm:$0xff] %v2293_v21  ;;  %v823_v21 = vmul.f32 %v1973_v18, %v2317_v47  ;;  %v661_v62 = vadd.f32 %v629_v52, %v564_v8  ;;  %v340_v8 = vld [vmem:[%s1944_s30 + $0xa8] sm:$0xff] }
  0x63   : > { %374 = vst.msk [vmem:[#allocation2 + $0x121] sm:$0xff] %vm263_vm1, %v341_v44  ;;  %v2311_v44 = vld [vmem:[#allocation2 + $0x9a] sm:$0xff]  ;;  %v940_v29 = vadd.f32 %v908_v9, %v843_v51 }
  0x64   : > { %3256 = vst [vmem:[#allocation16_spill] sm:$0xff] %v2305_v38  ;;  %v1205_v33 = vmul.f32 %v2021_v39, %v2311_v44  ;;  %v758_v52 = vadd.f32 %v726_v61, %v661_v62  ;;  %v345_v61 = vld [vmem:[%s1944_s30 + $0xd0] sm:$0xff] }
  0x65   : > { %375 = vst.msk [vmem:[#allocation2 + $0x129] sm:$0xff] %vm263_vm1, %v342_v49  ;;  %v1011_v49 = vmul.f32 %v1995_v27, %v2291_v19  ;;  %v1038_v51 = vadd.f32 %v1006_v63, %v940_v29  ;;  %v2386_v63 = vld [vmem:[#allocation2 + $0xe0] sm:$0xff] }
  0x66   : > { %3257 = vst [vmem:[#allocation17_spill] sm:$0xff] %v2317_v47  ;;  %v855_v62 = vadd.f32 %v823_v21, %v758_v52  ;;  %v2378_v21 = vld [vmem:[#allocation2 + $0xa8] sm:$0xff] }
  0x67   : > { %3258 = vst [vmem:[#allocation18_spill] sm:$0xff] %v2324_v42  ;;  %v1043_v35 = vadd.f32 %v1011_v49, %v945_v16  ;;  %v623_v49 = vmul.f32 %v2254_v45, %v1958_v7  ;;  %v1115_v16 = vmul.f32 %v2005_v31, %v2342_v28  ;;  %v558_v45 = vadd.f32 %v526_v53, %v429_v15  ;;  %v2380_v53 = vld [vmem:[#allocation2 + $0xca] sm:$0xff] }
  0x68   : > { %376 = vst.msk [vmem:[#allocation2 + $0x139] sm:$0xff] %vm263_vm1, %v343_v23  ;;  %v1042_v23 = vadd.f32 %v1010_v26, %v944_v12  ;;  %v2350_v12 = vld [vmem:[#allocation2 + $0xf2] sm:$0xff] }
  0x69   : > { %372 = vst.msk [vmem:[#allocation2 + $0x109] sm:$0xff] %vm263_vm1, %v339_v48  ;;  %v1140_v6 = vadd.f32 %v1108_v13, %v1043_v35  ;;  %v720_v48 = vmul.f32 %v2266_v54, %v1971_v17  ;;  %v2369_v13 = vld [vmem:[#allocation2 + $0xc9] sm:$0xff]  ;;  %v346_v35 = vld [vmem:[%s1944_s30 + $0xd8] sm:$0xff]  ;;  %v1212_v9 = vmul.f32 %v2021_v39, %v2350_v12  ;;  %v655_v52 = vadd.f32 %v623_v49, %v558_v45 }
  0x6a   : > { %v1139_v26 = vadd.f32 %v1107_v32, %v1042_v23  ;;  %v1103_v32 = vmul.f32 %v2005_v31, %v2207_v11  ;;  %373 = vst.msk [vmem:[#allocation2 + $0x111] sm:$0xff] %vm263_vm1, %v340_v8  ;;  %v1200_v8 = vmul.f32 %v2021_v39, %v2223_v22  ;;  %v2384_v54 = vld [vmem:[#allocation2 + $0xa9] sm:$0xff]  ;;  %v914_v22 = vmul.f32 %v2275_v60, %v1979_v20 }
  0x6b   : > { %3259 = vst [vmem:[#allocation19_spill] sm:$0xff] %v2367_v30  ;;  %v1237_v15 = vadd.f32 %v1205_v33, %v1140_v6  ;;  %v533_v33 = vmul.f32 %v1953_v5, %v2369_v13  ;;  %v1012_v49 = vmul.f32 %v1995_v27, %v2378_v21  ;;  %v630_v6 = vmul.f32 %v1958_v7, %v2380_v53 }
  0x6c   : > { %v1236_v23 = vadd.f32 %v1204_v1, %v1139_v26  ;;  %3260 = vst [vmem:[#allocation20_spill] sm:$0xff] %v2369_v13  ;;  %v817_v1 = vmul.f32 %v2268_v56, %v1973_v18  ;;  %v952_v26 = vadd.f32 %v920_v40, %v855_v62  ;;  %v1135_v29 = vadd.f32 %v1103_v32, %v1038_v51  ;;  %v2391_v56 = vld [vmem:[#allocation2 + $0xaa] sm:$0xff]  ;;  %v2403_v32 = vld [vmem:[#allocation2 + $0xe1] sm:$0xff] }
  0x6d   : > { %3261 = vst [vmem:[#allocation21_spill] sm:$0xff] %v2380_v53  ;;  %v752_v40 = vadd.f32 %v720_v48, %v655_v52  ;;  %v2409_v51 = vld [vmem:[#allocation2 + $0xe2] sm:$0xff]  ;;  %v2414_v52 = vld [vmem:[#allocation2 + $0xf8] sm:$0xff] }
  0x6e   : > { %377 = vst.msk [vmem:[#allocation2 + $0x141] sm:$0xff] %vm263_vm1, %v344_v58  ;;  %v1272_v50 = vadd.f32 %v2051_v55, %v1236_v23  ;;  %v436_v58 = vmul.f32 %v1948_v3, %v2367_v30  ;;  %v1050_v45 = vadd.f32 %v1018_v46, %v952_v26  ;;  %v1109_v23 = vmul.f32 %v2005_v31, %v2384_v54 }
  0x6f   : > { %3262 = vst [vmem:[#allocation22_spill] sm:$0xff] %v2386_v63  ;;  %v1273_v46 = vadd.f32 %v2051_v55, %v1237_v15  ;;  %v1206_v26 = vmul.f32 %v2021_v39, %v2391_v56 }
  0x70   : > { %378 = vst.msk [vmem:[#allocation2 + $0x151] sm:$0xff] %vm263_vm1, %v345_v61  ;;  %1825 = vmatmul.msk.f32.vlgmr.msra.gmra.mxu1 %vm263_vm1, %v1272_v50  ;;  %v1232_v61 = vadd.f32 %v1200_v8, %v1135_v29  ;;  %v565_v62 = vadd.f32 %v533_v33, %v436_v58  ;;  %v1147_v48 = vadd.f32 %v1115_v16, %v1050_v45 }
  0x71   : > { %379 = vst.msk [vmem:[#allocation2 + $0x159] sm:$0xff] %vm263_vm1, %v346_v35  ;;  %v727_v35 = vmul.f32 %v1971_v17, %v2386_v63  ;;  %v849_v50 = vadd.f32 %v817_v1, %v752_v40  ;;  %v824_v58 = vmul.f32 %v1973_v18, %v2403_v32  ;;  %v715_v33 = vmul.f32 %v2195_v0, %v1971_v17  ;;  %v2428_v40 = vld [vmem:[#allocation2 + $0xf9] sm:$0xff] }
  0x72   : > { %3263 = vst [vmem:[#allocation23_spill] sm:$0xff] %v2403_v32  ;;  %v1268_v8 = vadd.f32 %v2051_v55, %v1232_v61  ;;  %v662_v29 = vadd.f32 %v630_v6, %v565_v62  ;;  %v1244_v53 = vadd.f32 %v1212_v9, %v1147_v48  ;;  %v921_v16 = vmul.f32 %v1979_v20, %v2409_v51 }
  0x73   : > { %3264 = vst [vmem:[#allocation24_spill] sm:$0xff] %v2409_v51  ;;  %v946_v13 = vadd.f32 %v914_v22, %v849_v50  ;;  %v812_v1 = vmul.f32 %v2197_v2, %v1973_v18  ;;  %v1019_v45 = vmul.f32 %v1995_v27, %v2414_v52  ;;  %v747_v6 = vadd.f32 %v715_v33, %v2251_v43  ;;  %v2438_v50 = vld [vmem:[#allocation2 + $0xfa] sm:$0xff] }
  0x74   : > { %1821 = vmatmul.msk.f32.gmra.mxu0 %vm263_vm1, %v1268_v8  ;;  %v759_v15 = vadd.f32 %v727_v35, %v662_v29  ;;  %v909_v9 = vmul.f32 %v2213_v14, %v1979_v20  ;;  %v1280_v22 = vadd.f32 %v2051_v55, %v1244_v53  ;;  %v1007_v62 = vmul.f32 %v1995_v27, %v2227_v24 }
  0x75   : > { %v1044_v61 = vadd.f32 %v1012_v49, %v946_v13  ;;  %v430_v48 = vmul.f32 %v2247_v41, %v1948_v3  ;;  %v844_v8 = vadd.f32 %v812_v1, %v747_v6  ;;  %v527_v29 = vmul.f32 %v2258_v34, %v1953_v5  ;;  %v2458_v34 = vld [vmem:[#allocation2 + $0xb0] sm:$0xff] }
  0x76   : > { %v856_v35 = vadd.f32 %v824_v58, %v759_v15  ;;  %v624_v43 = vmul.f32 %v2270_v57, %v1958_v7  ;;  %1833 = vmatmul.msk.f32.vlgmr.msra.gmra.mxu2 %vm263_vm1, %v1280_v22  ;;  %v1116_v53 = vmul.f32 %v2005_v31, %v2428_v40  ;;  %v1104_v49 = vmul.f32 %v2005_v31, %v2229_v25 }
  0x77   : > { %v1141_v13 = vadd.f32 %v1109_v23, %v1044_v61  ;;  %v941_v33 = vadd.f32 %v909_v9, %v844_v8  ;;  %v559_v1 = vadd.f32 %v527_v29, %v430_v48  ;;  %v721_v15 = vmul.f32 %v2291_v19, %v1971_v17 }
  0x78   : > { %1826 = vmatmul.msk.f32.gmra.mxu1 %vm263_vm1, %v1273_v46  ;;  %v953_v58 = vadd.f32 %v921_v16, %v856_v35  ;;  %v1213_v30 = vmul.f32 %v2021_v39, %v2438_v50  ;;  %v1201_v46 = vmul.f32 %v2021_v39, %v2242_v36  ;;  %v818_v23 = vmul.f32 %v2303_v37, %v1973_v18  ;;  %v2460_v16 = vld [vmem:[#allocation2 + $0xb1] sm:$0xff] }
  0x79   : > { %v1238_v6 = vadd.f32 %v1206_v26, %v1141_v13  ;;  %v1039_v61 = vadd.f32 %v1007_v62, %v941_v33  ;;  %v656_v57 = vadd.f32 %v624_v43, %v559_v1  ;;  %3265 = vst [vmem:[#allocation25_spill] sm:$0xff] %v2460_v16  ;;  %v437_v9 = vmul.f32 %v2305_v38, %v1948_v3  ;;  %v2471_v43 = vld [vmem:[#allocation2 + $0x120] sm:$0xff]  ;;  %v2490_v38 = vld [vmem:[#allocation2 + $0x108] sm:$0xff] }
  0x7a   : > { %v1051_v22 = vadd.f32 %v1019_v45, %v953_v58  ;;  %v534_v48 = vmul.f32 %v2317_v47, %v1953_v5  ;;  %v631_v35 = vmul.f32 %v2324_v42, %v1958_v7  ;;  %v915_v62 = vmul.f32 %v2311_v44, %v1979_v20  ;;  %3266 = vst [vmem:[#allocation26_spill] sm:$0xff] %v2471_v43  ;;  %v2473_v13 = vld [vmem:[#allocation2 + $0x121] sm:$0xff]  ;;  %v2487_v42 = vld [vmem:[#allocation2 + $0x138] sm:$0xff] }
  0x7b   : > { %v1274_v26 = vadd.f32 %v2051_v55, %v1238_v6  ;;  %v1136_v29 = vadd.f32 %v1104_v49, %v1039_v61  ;;  %v753_v45 = vadd.f32 %v721_v15, %v656_v57  ;;  %3267 = vst [vmem:[#allocation27_spill] sm:$0xff] %v2473_v13  ;;  %v2475_v58 = vld [vmem:[#allocation2 + $0x122] sm:$0xff]  ;;  %v1013_v33 = vmul.f32 %v1995_v27, %v2458_v34  ;;  %v2481_v6 = vld [vmem:[#allocation2 + $0xb2] sm:$0xff] }
  0x7c   : > { %v1148_v8 = vadd.f32 %v1116_v53, %v1051_v22  ;;  %3268 = vst [vmem:[#allocation28_spill] sm:$0xff] %v2475_v58  ;;  %v1110_v1 = vmul.f32 %v2005_v31, %v2460_v16  ;;  %v566_v53 = vadd.f32 %v534_v48, %v437_v9  ;;  %v728_v57 = vmul.f32 %v2326_v4, %v1971_v17  ;;  %v2492_v16 = vld [vmem:[#allocation2 + $0x109] sm:$0xff] }
  0x7d   : > { %v1233_v15 = vadd.f32 %v1201_v46, %v1136_v29  ;;  %v850_v22 = vadd.f32 %v818_v23, %v753_v45  ;;  %v825_v61 = vmul.f32 %v2342_v28, %v1973_v18  ;;  %3269 = vst [vmem:[#allocation29_spill] sm:$0xff] %v2487_v42  ;;  %v443_v9 = vmul.f32 %v1948_v3, %v2471_v43  ;;  %v347_v29 = vld [vmem:[%s1944_s30 + $0xe0] sm:$0xff]  ;;  %v2509_v43 = vld [vmem:[#allocation2 + $0x10a] sm:$0xff] }
  0x7e   : > { %v1245_v49 = vadd.f32 %v1213_v30, %v1148_v8  ;;  %v663_v47 = vadd.f32 %v631_v35, %v566_v53  ;;  %3270 = vst [vmem:[#allocation30_spill] sm:$0xff] %v2490_v38  ;;  %v540_v30 = vmul.f32 %v1953_v5, %v2473_v13  ;;  %v637_v46 = vmul.f32 %v1958_v7, %v2475_v58  ;;  %v2504_v35 = vld [vmem:[#allocation2 + $0x139] sm:$0xff] }
  0x7f   : > { %3271 = vst [vmem:[#allocation31_spill] sm:$0xff] %v2492_v16  ;;  %v1269_v48 = vadd.f32 %v2051_v55, %v1233_v15  ;;  %v947_v8 = vadd.f32 %v915_v62, %v850_v22  ;;  %v922_v53 = vmul.f32 %v2350_v12, %v1979_v20  ;;  %v734_v58 = vmul.f32 %v1971_v17, %v2487_v42  ;;  %v2522_v15 = vld [vmem:[#allocation2 + $0x150] sm:$0xff] }
  0x80   : > { %1827 = vmatmul.msk.f32.gmra.mxu1 %vm263_vm1, %v1274_v26  ;;  %v1281_v23 = vadd.f32 %v2051_v55, %v1245_v49  ;;  %v1207_v26 = vmul.f32 %v2021_v39, %v2481_v6  ;;  %3272 = vst [vmem:[#allocation32_spill] sm:$0xff] %v2504_v35  ;;  %v760_v45 = vadd.f32 %v728_v57, %v663_v47  ;;  %v2520_v49 = vld [vmem:[#allocation2 + $0x13a] sm:$0xff] }
  0x81   : > { %3273 = vst [vmem:[#allocation33_spill] sm:$0xff] %v2509_v43  ;;  %v572_v13 = vadd.f32 %v540_v30, %v443_v9  ;;  %1822 = vmatmul.msk.f32.gmra.mxu0 %vm263_vm1, %v1269_v48  ;;  %v1045_v62 = vadd.f32 %v1013_v33, %v947_v8  ;;  %v1020_v47 = vmul.f32 %v1995_v27, %v2490_v38 }
  0x82   : > { %380 = vst.msk [vmem:[#allocation2 + $0x169] sm:$0xff] %vm263_vm1, %v347_v29  ;;  %1834 = vmatmul.msk.f32.gmra.mxu2 %vm263_vm1, %v1281_v23  ;;  %v1117_v57 = vmul.f32 %v2005_v31, %v2492_v16  ;;  %v857_v22 = vadd.f32 %v825_v61, %v760_v45  ;;  %v831_v30 = vmul.f32 %v1973_v18, %v2504_v35  ;;  %v2526_v23 = vld [vmem:[#allocation2 + $0x151] sm:$0xff]  ;;  %v348_v61 = vld [vmem:[%s1944_s30 + $0xe8] sm:$0xff] }
  0x83   : > { %3274 = vst [vmem:[#allocation34_spill] sm:$0xff] %v2520_v49  ;;  %v669_v9 = vadd.f32 %v637_v46, %v572_v13  ;;  %v425_v33 = vmul.f32 %v2183_v59, %v1948_v3  ;;  %v1142_v48 = vadd.f32 %v1110_v1, %v1045_v62  ;;  %v1214_v8 = vmul.f32 %v2021_v39, %v2509_v43  ;;  %v3277_v29 = vld [vmem:[#allocation3_spill] sm:$0xff]  ;;  %v3278_v16 = vld [vmem:[#allocation4_spill] sm:$0xff] }
  0x84   : > { %3275 = vst [vmem:[#allocation35_spill] sm:$0xff] %v2522_v15  ;;  %v522_v42 = vmul.f32 %v3277_v29, %v1953_v5  ;;  %v619_v38 = vmul.f32 %v3278_v16, %v1958_v7  ;;  %v954_v13 = vadd.f32 %v922_v53, %v857_v22  ;;  %v928_v45 = vmul.f32 %v1979_v20, %v2520_v49  ;;  %v2544_v62 = vld [vmem:[#allocation2 + $0x152] sm:$0xff] }
  0x85   : > { %3276 = vst [vmem:[#allocation36_spill] sm:$0xff] %v2526_v23  ;;  %v766_v46 = vadd.f32 %v734_v58, %v669_v9  ;;  %v1026_v35 = vmul.f32 %v1995_v27, %v2522_v15  ;;  %v1239_v59 = vadd.f32 %v1207_v26, %v1142_v48  ;;  %v1123_v1 = vmul.f32 %v2005_v31, %v2526_v23  ;;  %v3279_v9 = vld [vmem:[#allocation10_spill] sm:$0xff]  ;;  %v3280_v48 = vld [vmem:[#allocation11_spill] sm:$0xff] }
  0x86   : > { %381 = vst.msk [vmem:[#allocation2 + $0x171] sm:$0xff] %vm263_vm1, %v348_v61  ;;  %v554_v29 = vadd.f32 %v522_v42, %v425_v33  ;;  %v716_v16 = vmul.f32 %v1971_v17, %v2205_v10  ;;  %v1052_v53 = vadd.f32 %v1020_v47, %v954_v13  ;;  %v813_v22 = vmul.f32 %v1973_v18, %v2207_v11  ;;  %v3281_v47 = vld [vmem:[#allocation5_spill] sm:$0xff]  ;;  %v3282_v13 = vld [vmem:[#allocation6_spill] sm:$0xff] }
  0x87   : > { %v863_v58 = vadd.f32 %v831_v30, %v766_v46  ;;  %v431_v15 = vmul.f32 %v3279_v9, %v1948_v3  ;;  %v1275_v61 = vadd.f32 %v2051_v55, %v1239_v59  ;;  %v528_v23 = vmul.f32 %v3280_v48, %v1953_v5 }
  0x88   : > { %v651_v26 = vadd.f32 %v619_v38, %v554_v29  ;;  %v625_v42 = vmul.f32 %v2275_v60, %v1958_v7  ;;  %v1149_v33 = vadd.f32 %v1117_v57, %v1052_v53  ;;  %v1220_v10 = vmul.f32 %v2021_v39, %v2544_v62  ;;  %v3283_v57 = vld [vmem:[#allocation7_spill] sm:$0xff] }
  0x89   : > { %v960_v49 = vadd.f32 %v928_v45, %v863_v58  ;;  %v910_v11 = vmul.f32 %v1979_v20, %v3281_v47  ;;  %1828 = vmatmul.msk.f32.gmra.mxu1 %vm263_vm1, %v1275_v61  ;;  %v1008_v38 = vmul.f32 %v1995_v27, %v3282_v13  ;;  %v560_v46 = vadd.f32 %v528_v23, %v431_v15  ;;  %v2585_v47 = vld [vmem:[#allocation2 + $0x12a] sm:$0xff] }
  0x8a   : > { %v748_v30 = vadd.f32 %v716_v16, %v651_v26  ;;  %v722_v59 = vmul.f32 %v2378_v21, %v1971_v17  ;;  %v1246_v29 = vadd.f32 %v1214_v8, %v1149_v33  ;;  %v1105_v45 = vmul.f32 %v2005_v31, %v3283_v57  ;;  %v2583_v33 = vld [vmem:[#allocation2 + $0x129] sm:$0xff]  ;;  %3286 = vst [vmem:[#allocation10_spill] sm:$0xff] %v2585_v47 }
  0x8b   : > { %v1058_v60 = vadd.f32 %v1026_v35, %v960_v49  ;;  %v819_v53 = vmul.f32 %v2384_v54, %v1973_v18  ;;  %v657_v9 = vadd.f32 %v625_v42, %v560_v46  ;;  %v438_v16 = vmul.f32 %v2386_v63, %v1948_v3  ;;  %v2581_v42 = vld [vmem:[#allocation2 + $0x128] sm:$0xff]  ;;  %3285 = vst [vmem:[#allocation4_spill] sm:$0xff] %v2583_v33  ;;  %v3288_v46 = vld [vmem:[#allocation13_spill] sm:$0xff] }
  0x8c   : > { %v845_v58 = vadd.f32 %v813_v22, %v748_v30  ;;  %v535_v61 = vmul.f32 %v2403_v32, %v1953_v5  ;;  %v1282_v15 = vadd.f32 %v2051_v55, %v1246_v29  ;;  %v916_v35 = vmul.f32 %v2391_v56, %v1979_v20  ;;  %3284 = vst [vmem:[#allocation3_spill] sm:$0xff] %v2581_v42  ;;  %v3287_v30 = vld [vmem:[#allocation8_spill] sm:$0xff] }
  0x8d   : > { %v1155_v23 = vadd.f32 %v1123_v1, %v1058_v60  ;;  %v632_v49 = vmul.f32 %v2409_v51, %v1958_v7  ;;  %v754_v26 = vadd.f32 %v722_v59, %v657_v9  ;;  %v729_v22 = vmul.f32 %v2414_v52, %v1971_v17  ;;  %v3289_v59 = vld [vmem:[#allocation14_spill] sm:$0xff] }
  0x8e   : > { %v942_v8 = vadd.f32 %v910_v11, %v845_v58  ;;  %v567_v48 = vadd.f32 %v535_v61, %v438_v16  ;;  %1835 = vmatmul.msk.f32.gmra.mxu2 %vm263_vm1, %v1282_v15  ;;  %v1202_v13 = vmul.f32 %v2021_v39, %v3287_v30  ;;  %v1014_v11 = vmul.f32 %v1995_v27, %v3288_v46  ;;  %v2596_v16 = vld [vmem:[#allocation2 + $0x110] sm:$0xff]  ;;  %v2598_v61 = vld [vmem:[#allocation2 + $0x140] sm:$0xff] }
  0x8f   : > { %v1252_v1 = vadd.f32 %v1220_v10, %v1155_v23  ;;  %v1111_v29 = vmul.f32 %v2005_v31, %v3289_v59  ;;  %v851_v57 = vadd.f32 %v819_v53, %v754_v26  ;;  %v826_v9 = vmul.f32 %v2428_v40, %v1973_v18  ;;  %v2601_v15 = vld [vmem:[#allocation2 + $0x111] sm:$0xff] }
  0x90   : > { %v1040_v60 = vadd.f32 %v1008_v38, %v942_v8  ;;  %v664_v58 = vadd.f32 %v632_v49, %v567_v48  ;;  %v444_v23 = vmul.f32 %v1948_v3, %v2581_v42  ;;  %v541_v30 = vmul.f32 %v1953_v5, %v2583_v33  ;;  %v2611_v48 = vld [vmem:[#allocation2 + $0x141] sm:$0xff]  ;;  %v2628_v42 = vld [vmem:[#allocation2 + $0x158] sm:$0xff] }
  0x91   : > { %v1288_v10 = vadd.f32 %v2051_v55, %v1252_v1  ;;  %v638_v38 = vmul.f32 %v1958_v7, %v2585_v47  ;;  %v948_v49 = vadd.f32 %v916_v35, %v851_v57  ;;  %v923_v26 = vmul.f32 %v2438_v50, %v1979_v20  ;;  %v3290_v1 = vld [vmem:[#allocation15_spill] sm:$0xff]  ;;  %v2622_v57 = vld [vmem:[#allocation2 + $0x142] sm:$0xff] }
  0x92   : > { %v1137_v53 = vadd.f32 %v1105_v45, %v1040_v60  ;;  %v761_v8 = vadd.f32 %v729_v22, %v664_v58  ;;  %v1208_v51 = vmul.f32 %v2021_v39, %v3290_v1  ;;  %v1021_v32 = vmul.f32 %v1995_v27, %v2596_v16  ;;  %v2624_v58 = vld [vmem:[#allocation2 + $0x112] sm:$0xff] }
  0x93   : > { %1841 = vmatmul.msk.f32.vlgmr.msra.gmra.mxu3 %vm263_vm1, %v1288_v10  ;;  %v573_v63 = vadd.f32 %v541_v30, %v444_v23  ;;  %v735_v47 = vmul.f32 %v1971_v17, %v2598_v61  ;;  %v1046_v35 = vadd.f32 %v1014_v11, %v948_v49  ;;  %v1118_v60 = vmul.f32 %v2005_v31, %v2601_v15 }
  0x94   : > { %v1234_v45 = vadd.f32 %v1202_v13, %v1137_v53  ;;  %v858_v22 = vadd.f32 %v826_v9, %v761_v8  ;;  %v832_v33 = vmul.f32 %v1973_v18, %v2611_v48  ;;  %v426_v23 = vmul.f32 %v2195_v0, %v1948_v3  ;;  %v2635_v53 = vld [vmem:[#allocation2 + $0x159] sm:$0xff] }
  0x95   : > { %v670_v10 = vadd.f32 %v638_v38, %v573_v63  ;;  %v523_v13 = vmul.f32 %v2197_v2, %v1953_v5  ;;  %v1143_v9 = vadd.f32 %v1111_v29, %v1046_v35  ;;  %v620_v63 = vmul.f32 %v2213_v14, %v1958_v7  ;;  %v2650_v35 = vld [vmem:[#allocation2 + $0x15a] sm:$0xff] }
  0x96   : > { %v1270_v11 = vadd.f32 %v2051_v55, %v1234_v45  ;;  %v955_v30 = vadd.f32 %v923_v26, %v858_v22  ;;  %v929_v49 = vmul.f32 %v1979_v20, %v2622_v57  ;;  %v717_v0 = vmul.f32 %v1971_v17, %v2227_v24 }
  0x97   : > { %v767_v38 = vadd.f32 %v735_v47, %v670_v10  ;;  %v555_v8 = vadd.f32 %v523_v13, %v426_v23  ;;  %v1240_v2 = vadd.f32 %v1208_v51, %v1143_v9  ;;  %v1215_v29 = vmul.f32 %v2021_v39, %v2624_v58  ;;  %v349_v13 = vld [vmem:[%s1944_s30 + $0xf0] sm:$0xff] }
  0x98   : > { %1823 = vmatmul.msk.f32.gmra.mxu0 %vm263_vm1, %v1270_v11  ;;  %v1053_v45 = vadd.f32 %v1021_v32, %v955_v30  ;;  %v1027_v26 = vmul.f32 %v1995_v27, %v2628_v42  ;;  %v1124_v47 = vmul.f32 %v2005_v31, %v2635_v53  ;;  %v814_v24 = vmul.f32 %v1973_v18, %v2229_v25 }
  0x99   : > { %v864_v14 = vadd.f32 %v832_v33, %v767_v38  ;;  %v652_v22 = vadd.f32 %v620_v63, %v555_v8  ;;  %v1276_v10 = vadd.f32 %v2051_v55, %v1240_v2  ;;  %v432_v32 = vmul.f32 %v2291_v19, %v1948_v3  ;;  %382 = vst.msk [vmem:[#allocation2 + $0x181] sm:$0xff] %vm263_vm1, %v349_v13  ;;  %v3292_v2 = vld [vmem:[#allocation25_spill] sm:$0xff]  ;;  %v3295_v13 = vld [vmem:[#allocation30_spill] sm:$0xff] }
  0x9a   : > { %v1150_v51 = vadd.f32 %v1118_v60, %v1053_v45  ;;  %v529_v23 = vmul.f32 %v2303_v37, %v1953_v5  ;;  %v911_v9 = vmul.f32 %v1979_v20, %v2242_v36  ;;  %v626_v30 = vmul.f32 %v2311_v44, %v1958_v7 }
  0x9b   : > { %v961_v33 = vadd.f32 %v929_v49, %v864_v14  ;;  %v749_v11 = vadd.f32 %v717_v0, %v652_v22  ;;  %1829 = vmatmul.msk.f32.gmra.mxu1 %vm263_vm1, %v1276_v10  ;;  %v1221_v19 = vmul.f32 %v2021_v39, %v2650_v35  ;;  %v723_v37 = vmul.f32 %v2458_v34, %v1971_v17  ;;  %v3291_v49 = vld [vmem:[#allocation9_spill] sm:$0xff] }
  0x9c   : > { %v1247_v25 = vadd.f32 %v1215_v29, %v1150_v51  ;;  %v561_v60 = vadd.f32 %v529_v23, %v432_v32  ;;  %v1009_v36 = vmul.f32 %v1995_v27, %v2247_v41  ;;  %v1106_v44 = vmul.f32 %v2005_v31, %v3291_v49  ;;  %v350_v29 = vld [vmem:[%s1944_s30 + $0xf8] sm:$0xff] }
  0x9d   : > { %v1059_v63 = vadd.f32 %v1027_v26, %v961_v33  ;;  %v846_v38 = vadd.f32 %v814_v24, %v749_v11  ;;  %v820_v45 = vmul.f32 %v3292_v2, %v1973_v18  ;;  %v439_v39 = vmul.f32 %v2326_v4, %v1948_v3  ;;  %383 = vst.msk [vmem:[#allocation2 + $0x189] sm:$0xff] %vm263_vm1, %v350_v29  ;;  %v3293_v24 = vld [vmem:[#allocation12_spill] sm:$0xff] }
  0x9e   : > { %v1283_v8 = vadd.f32 %v2051_v55, %v1247_v25  ;;  %v658_v0 = vadd.f32 %v626_v30, %v561_v60  ;;  %v536_v26 = vmul.f32 %v2342_v28, %v1953_v5  ;;  %v633_v41 = vmul.f32 %v2350_v12, %v1958_v7  ;;  %v2689_v55 = vld [vmem:[%s3180_s1 + $0x8] ss:$0 sm:$0xff]  ;;  %v3294_v28 = vld [vmem:[#allocation19_spill] sm:$0xff] }
  0x9f   : > { %v1156_v14 = vadd.f32 %v1124_v47, %v1059_v63  ;;  %v943_v22 = vadd.f32 %v911_v9, %v846_v38  ;;  %v1203_v4 = vmul.f32 %v2689_v55, %v3293_v24  ;;  %v917_v10 = vmul.f32 %v2481_v6, %v1979_v20  ;;  %v3296_v9 = vld [vmem:[#allocation20_spill] sm:$0xff]  ;;  %v3297_v25 = vld [vmem:[#allocation31_spill] sm:$0xff]  ;;  %v2708_v38 = vld [vmem:[%s3181_s2] ss:$0 sm:$0xff] }
  0xa0   : > { %1836 = vmatmul.msk.f32.gmra.mxu2 %vm263_vm1, %v1283_v8  ;;  %v755_v47 = vadd.f32 %v723_v37, %v658_v0  ;;  %v1015_v51 = vmul.f32 %v1995_v27, %v3294_v28  ;;  %v568_v23 = vadd.f32 %v536_v26, %v439_v39  ;;  %v730_v33 = vmul.f32 %v3295_v13, %v1971_v17  ;;  %v3298_v37 = vld [vmem:[#allocation29_spill] sm:$0xff]  ;;  %v3299_v8 = vld [vmem:[#allocation32_spill] sm:$0xff] }
  0xa1   : > { %v1253_v12 = vadd.f32 %v1221_v19, %v1156_v14  ;;  %v1041_v32 = vadd.f32 %v1009_v36, %v943_v22  ;;  %v1112_v30 = vmul.f32 %v2005_v31, %v3296_v9  ;;  %v827_v60 = vmul.f32 %v3297_v25, %v1973_v18  ;;  %v3300_v39 = vld [vmem:[#allocation21_spill] sm:$0xff]  ;;  %v3301_v22 = vld [vmem:[#allocation34_spill] sm:$0xff] }
  0xa2   : > { %v852_v11 = vadd.f32 %v820_v45, %v755_v47  ;;  %v445_v63 = vmul.f32 %v3298_v37, %v1948_v3  ;;  %v665_v49 = vadd.f32 %v633_v41, %v568_v23  ;;  %v542_v0 = vmul.f32 %v3299_v8, %v1953_v5  ;;  %v3303_v23 = vld [vmem:[#allocation26_spill] sm:$0xff]  ;;  %v3305_v37 = vld [vmem:[#allocation36_spill] sm:$0xff] }
  0xa3   : > { %v1289_v19 = vadd.f32 %v2708_v38, %v1253_v12  ;;  %v1138_v36 = vadd.f32 %v1106_v44, %v1041_v32  ;;  %v1209_v29 = vmul.f32 %v2689_v55, %v3300_v39  ;;  %v924_v14 = vmul.f32 %v2509_v43, %v1979_v20  ;;  %v3302_v44 = vld [vmem:[#allocation35_spill] sm:$0xff]  ;;  %v2728_v43 = vld [vmem:[#allocation2 + $0x168] sm:$0xff] }
  0xa4   : > { %v949_v45 = vadd.f32 %v917_v10, %v852_v11  ;;  %v639_v26 = vmul.f32 %v3301_v22, %v1958_v7  ;;  %v762_v47 = vadd.f32 %v730_v33, %v665_v49  ;;  %v574_v12 = vadd.f32 %v542_v0, %v445_v63  ;;  %v3304_v11 = vld [vmem:[#allocation27_spill] sm:$0xff]  ;;  %v3306_v49 = vld [vmem:[#allocation28_spill] sm:$0xff] }
  0xa5   : > { %1842 = vmatmul.msk.f32.gmra.mxu3 %vm263_vm1, %v1289_v19  ;;  %v1235_v24 = vadd.f32 %v1203_v4, %v1138_v36  ;;  %v736_v41 = vmul.f32 %v3302_v44, %v1971_v17  ;;  %v1022_v10 = vmul.f32 %v1995_v27, %v3303_v23  ;;  %v1119_v8 = vmul.f32 %v2005_v31, %v3304_v11  ;;  %v2731_v63 = vld [vmem:[#allocation2 + $0x169] sm:$0xff] }
  0xa6   : > { %v1047_v32 = vadd.f32 %v1015_v51, %v949_v45  ;;  %v833_v39 = vmul.f32 %v3305_v37, %v1973_v18  ;;  %v859_v4 = vadd.f32 %v827_v60, %v762_v47  ;;  %v671_v33 = vadd.f32 %v639_v26, %v574_v12  ;;  %v2748_v12 = vld [vmem:[#allocation2 + $0x16a] sm:$0xff] }
  0xa7   : > { %v1271_v19 = vadd.f32 %v2708_v38, %v1235_v24  ;;  %v433_v51 = vmul.f32 %v2378_v21, %v1948_v3  ;;  %v1216_v0 = vmul.f32 %v2689_v55, %v3306_v49  ;;  %v530_v45 = vmul.f32 %v2384_v54, %v1953_v5 }
  0xa8   : > { %v1144_v36 = vadd.f32 %v1112_v30, %v1047_v32  ;;  %v627_v22 = vmul.f32 %v2391_v56, %v1958_v7  ;;  %v956_v24 = vadd.f32 %v924_v14, %v859_v4  ;;  %v768_v60 = vadd.f32 %v736_v41, %v671_v33 }
  0xa9   : > { %1824 = vmatmul.msk.f32.gmra.mxu0 %vm263_vm1, %v1271_v19  ;;  %v930_v26 = vmul.f32 %v2544_v62, %v1979_v20  ;;  %v1028_v21 = vmul.f32 %v1995_v27, %v2728_v43  ;;  %v1125_v47 = vmul.f32 %v2005_v31, %v2731_v63  ;;  %v562_v54 = vadd.f32 %v530_v45, %v433_v51 }
  0xaa   : > { %v1241_v30 = vadd.f32 %v1209_v29, %v1144_v36  ;;  %v724_v56 = vmul.f32 %v1971_v17, %v3288_v46  ;;  %v1054_v32 = vadd.f32 %v1022_v10, %v956_v24  ;;  %v865_v19 = vadd.f32 %v833_v39, %v768_v60  ;;  %v3307_v39 = vld [vmem:[#allocation16_spill] sm:$0xff] }
  0xab   : > { %v821_v14 = vmul.f32 %v1973_v18, %v3289_v59  ;;  %v440_v41 = vmul.f32 %v2414_v52, %v1948_v3  ;;  %v659_v29 = vadd.f32 %v627_v22, %v562_v54  ;;  %v537_v33 = vmul.f32 %v2428_v40, %v1953_v5 }
  0xac   : > { %v1277_v4 = vadd.f32 %v2708_v38, %v1241_v30  ;;  %v634_v51 = vmul.f32 %v2438_v50, %v1958_v7  ;;  %v1151_v36 = vadd.f32 %v1119_v8, %v1054_v32  ;;  %v962_v45 = vadd.f32 %v930_v26, %v865_v19  ;;  %v3308_v8 = vld [vmem:[#allocation17_spill] sm:$0xff] }
  0xad   : > { %v1222_v46 = vmul.f32 %v2689_v55, %v2748_v12  ;;  %v918_v59 = vmul.f32 %v1979_v20, %v3290_v1  ;;  %v756_v52 = vadd.f32 %v724_v56, %v659_v29  ;;  %v1016_v22 = vmul.f32 %v1995_v27, %v3307_v39 }
  0xae   : > { %1830 = vmatmul.msk.f32.gmra.mxu1 %vm263_vm1, %v1277_v4  ;;  %v569_v10 = vadd.f32 %v537_v33, %v440_v41  ;;  %v731_v40 = vmul.f32 %v2596_v16, %v1971_v17  ;;  %v1248_v24 = vadd.f32 %v1216_v0, %v1151_v36  ;;  %v1060_v50 = vadd.f32 %v1028_v21, %v962_v45  ;;  %v3310_v45 = vld [vmem:[#allocation3_spill] sm:$0xff] }
  0xaf   : > { %v1113_v60 = vmul.f32 %v2005_v31, %v3308_v8  ;;  %v828_v26 = vmul.f32 %v2601_v15, %v1973_v18  ;;  %v853_v30 = vadd.f32 %v821_v14, %v756_v52  ;;  %v446_v54 = vmul.f32 %v2598_v61, %v1948_v3  ;;  %v3311_v52 = vld [vmem:[#allocation4_spill] sm:$0xff] }
  0xb0   : > { %v666_v1 = vadd.f32 %v634_v51, %v569_v10  ;;  %v543_v56 = vmul.f32 %v2611_v48, %v1953_v5  ;;  %v1284_v32 = vadd.f32 %v2708_v38, %v1248_v24  ;;  %v1157_v19 = vadd.f32 %v1125_v47, %v1060_v50  ;;  %v3309_v51 = vld [vmem:[#allocation18_spill] sm:$0xff]  ;;  %v2794_v50 = vld [vmem:[#allocation2 + $0x170] sm:$0xff] }
  0xb1   : > { %v925_v0 = vmul.f32 %v2624_v58, %v1979_v20  ;;  %v640_v21 = vmul.f32 %v2622_v57, %v1958_v7  ;;  %v950_v41 = vadd.f32 %v918_v59, %v853_v30  ;;  %v737_v14 = vmul.f32 %v2628_v42, %v1971_v17 }
  0xb2   : > { %v763_v4 = vadd.f32 %v731_v40, %v666_v1  ;;  %v575_v29 = vadd.f32 %v543_v56, %v446_v54  ;;  %1837 = vmatmul.msk.f32.gmra.mxu2 %vm263_vm1, %v1284_v32  ;;  %v1254_v33 = vadd.f32 %v1222_v46, %v1157_v19  ;;  %v1210_v36 = vmul.f32 %v2689_v55, %v3309_v51  ;;  %v2797_v46 = vld [vmem:[#allocation2 + $0x171] sm:$0xff]  ;;  %v3312_v19 = vld [vmem:[#allocation10_spill] sm:$0xff] }
  0xb3   : > { %v1023_v47 = vmul.f32 %v1995_v27, %v3310_v45  ;;  %v1120_v39 = vmul.f32 %v2005_v31, %v3311_v52  ;;  %v1048_v10 = vadd.f32 %v1016_v22, %v950_v41  ;;  %v834_v40 = vmul.f32 %v2635_v53, %v1973_v18 }
  0xb4   : > { %v860_v24 = vadd.f32 %v828_v26, %v763_v4  ;;  %v672_v59 = vadd.f32 %v640_v21, %v575_v29  ;;  %v1290_v8 = vadd.f32 %v2708_v38, %v1254_v33  ;;  %v434_v30 = vmul.f32 %v2458_v34, %v1948_v3  ;;  %v2816_v29 = vld [vmem:[#allocation2 + $0x172] sm:$0xff] }
  0xb5   : > { %v531_v1 = vmul.f32 %v3292_v2, %v1953_v5  ;;  %v628_v22 = vmul.f32 %v2481_v6, %v1958_v7  ;;  %v1145_v26 = vadd.f32 %v1113_v60, %v1048_v10  ;;  %v931_v32 = vmul.f32 %v2650_v35, %v1979_v20 }
  0xb6   : > { %v957_v54 = vadd.f32 %v925_v0, %v860_v24  ;;  %v769_v56 = vadd.f32 %v737_v14, %v672_v59  ;;  %1843 = vmatmul.msk.f32.gmra.mxu3 %vm263_vm1, %v1290_v8  ;;  %v1217_v21 = vmul.f32 %v2689_v55, %v3312_v19  ;;  %v1029_v34 = vmul.f32 %v1995_v27, %v2794_v50  ;;  %v3313_v24 = vld [vmem:[#allocation33_spill] sm:$0xff] }
  0xb7   : > { %v563_v41 = vadd.f32 %v531_v1, %v434_v30  ;;  %v725_v2 = vmul.f32 %v1971_v17, %v3294_v28  ;;  %v1242_v4 = vadd.f32 %v1210_v36, %v1145_v26  ;;  %v1126_v0 = vmul.f32 %v2005_v31, %v2797_v46  ;;  %v3314_v8 = vld [vmem:[#allocation21_spill] sm:$0xff] }
  0xb8   : > { %v1055_v6 = vadd.f32 %v1023_v47, %v957_v54  ;;  %v866_v60 = vadd.f32 %v834_v40, %v769_v56  ;;  %v822_v33 = vmul.f32 %v1973_v18, %v3296_v9  ;;  %v441_v51 = vmul.f32 %v3295_v13, %v1948_v3  ;;  %v3316_v56 = vld [vmem:[#allocation23_spill] sm:$0xff] }
  0xb9   : > { %v660_v14 = vadd.f32 %v628_v22, %v563_v41  ;;  %v538_v10 = vmul.f32 %v3297_v25, %v1953_v5  ;;  %v1278_v28 = vadd.f32 %v2708_v38, %v1242_v4  ;;  %v635_v59 = vmul.f32 %v3313_v24, %v1958_v7  ;;  %v3319_v24 = vld [vmem:[#allocation32_spill] sm:$0xff] }
  0xba   : > { %v1152_v36 = vadd.f32 %v1120_v39, %v1055_v6  ;;  %v963_v47 = vadd.f32 %v931_v32, %v866_v60  ;;  %v919_v30 = vmul.f32 %v1979_v20, %v3314_v8  ;;  %v732_v9 = vmul.f32 %v1971_v17, %v3303_v23  ;;  %v3315_v39 = vld [vmem:[#allocation22_spill] sm:$0xff] }
  0xbb   : > { %v757_v40 = vadd.f32 %v725_v2, %v660_v14  ;;  %v570_v1 = vadd.f32 %v538_v10, %v441_v51  ;;  %1831 = vmatmul.msk.f32.gmra.mxu1 %vm263_vm1, %v1278_v28  ;;  %v1223_v25 = vmul.f32 %v2689_v55, %v2816_v29  ;;  %v1017_v26 = vmul.f32 %v1995_v27, %v3315_v39  ;;  %v3317_v51 = vld [vmem:[#allocation24_spill] sm:$0xff]  ;;  %v3320_v39 = vld [vmem:[#allocation34_spill] sm:$0xff] }
  0xbc   : > { %v1249_v13 = vadd.f32 %v1217_v21, %v1152_v36  ;;  %v1061_v22 = vadd.f32 %v1029_v34, %v963_v47  ;;  %v1114_v32 = vmul.f32 %v2005_v31, %v3316_v56  ;;  %v829_v2 = vmul.f32 %v1973_v18, %v3304_v11  ;;  %v3318_v36 = vld [vmem:[#allocation29_spill] sm:$0xff] }
  0xbd   : > { %v854_v54 = vadd.f32 %v822_v33, %v757_v40  ;;  %v667_v41 = vadd.f32 %v635_v59, %v570_v1  ;;  %v447_v21 = vmul.f32 %v3302_v44, %v1948_v3  ;;  %v544_v34 = vmul.f32 %v3305_v37, %v1953_v5  ;;  %v997_v59 = vld [vmem:[#allocation2 + $0x180] sm:$0xff] }
  0xbe   : > { %v1285_v23 = vadd.f32 %v2708_v38, %v1249_v13  ;;  %v1158_v4 = vadd.f32 %v1126_v0, %v1061_v22  ;;  %v926_v14 = vmul.f32 %v1979_v20, %v3306_v49  ;;  %v641_v33 = vmul.f32 %v2544_v62, %v1958_v7  ;;  %v1094_v13 = vld [vmem:[#allocation2 + $0x181] sm:$0xff] }
  0xbf   : > { %v951_v6 = vadd.f32 %v919_v30, %v854_v54  ;;  %v764_v60 = vadd.f32 %v732_v9, %v667_v41  ;;  %v1211_v0 = vmul.f32 %v2689_v55, %v3317_v51  ;;  %v576_v10 = vadd.f32 %v544_v34, %v447_v21 }
  0xc0   : > { %1838 = vmatmul.msk.f32.gmra.mxu2 %vm263_vm1, %v1285_v23  ;;  %v1255_v11 = vadd.f32 %v1223_v25, %v1158_v4  ;;  %v738_v44 = vmul.f32 %v2728_v43, %v1971_v17  ;;  %v1024_v47 = vmul.f32 %v1995_v27, %v3318_v36  ;;  %v1121_v49 = vmul.f32 %v2005_v31, %v3319_v24  ;;  %v998_v36 = vld [vmem:[#allocation2 + $0x188] sm:$0xff] }
  0xc1   : > { %v1049_v28 = vadd.f32 %v1017_v26, %v951_v6  ;;  %v861_v37 = vadd.f32 %v829_v2, %v764_v60  ;;  %v673_v40 = vadd.f32 %v641_v33, %v576_v10  ;;  %v835_v8 = vmul.f32 %v2731_v63, %v1973_v18  ;;  %v1191_v2 = vld [vmem:[#allocation2 + $0x182] sm:$0xff] }
  0xc2   : > { %v1291_v62 = vadd.f32 %v2708_v38, %v1255_v11  ;;  %v442_v30 = vmul.f32 %v2596_v16, %v1948_v3  ;;  %v539_v22 = vmul.f32 %v2601_v15, %v1953_v5  ;;  %v636_v25 = vmul.f32 %v2624_v58, %v1958_v7 }
  0xc3   : > { %v1146_v1 = vadd.f32 %v1114_v32, %v1049_v28  ;;  %v958_v9 = vadd.f32 %v926_v14, %v861_v37  ;;  %v1218_v26 = vmul.f32 %v2689_v55, %v3320_v39  ;;  %v770_v54 = vadd.f32 %v738_v44, %v673_v40  ;;  %v1418_v40 = vpop.f32.mrf.mxu0 }
  0xc4   : > { %1844 = vmatmul.msk.f32.gmra.mxu3 %vm263_vm1, %v1291_v62  ;;  %v932_v56 = vmul.f32 %v2748_v12, %v1979_v20  ;;  %v1030_v16 = vmul.f32 %v1995_v27, %v997_v59  ;;  %v571_v23 = vadd.f32 %v539_v22, %v442_v30  ;;  %v733_v15 = vmul.f32 %v1971_v17, %v3310_v45 }
  0xc5   : > { %v1243_v32 = vadd.f32 %v1211_v0, %v1146_v1  ;;  %v1056_v41 = vadd.f32 %v1024_v47, %v958_v9  ;;  %v867_v4 = vadd.f32 %v835_v8, %v770_v54  ;;  %v1127_v58 = vmul.f32 %v2005_v31, %v1094_v13 }
  0xc6   : > { %v830_v21 = vmul.f32 %v1973_v18, %v3311_v52  ;;  %v448_v34 = vmul.f32 %v2628_v42, %v1948_v3  ;;  %v668_v14 = vadd.f32 %v636_v25, %v571_v23  ;;  %v545_v33 = vmul.f32 %v2635_v53, %v1953_v5 }
  0xc7   : > { %v1279_v6 = vadd.f32 %v2708_v38, %v1243_v32  ;;  %v1153_v60 = vadd.f32 %v1121_v49, %v1056_v41  ;;  %v964_v11 = vadd.f32 %v932_v56, %v867_v4  ;;  %v1224_v51 = vmul.f32 %v2689_v55, %v1191_v2  ;;  %v1095_v49 = vld [vmem:[#allocation2 + $0x189] sm:$0xff] }
  0xc8   : > { %v927_v45 = vmul.f32 %v1979_v20, %v3312_v19  ;;  %v642_v0 = vmul.f32 %v2650_v35, %v1958_v7  ;;  %v765_v42 = vadd.f32 %v733_v15, %v668_v14  ;;  %v577_v10 = vadd.f32 %v545_v33, %v448_v34  ;;  %v1096_v15 = vld [vmem:[#allocation2 + $0x199] sm:$0xff] }
  0xc9   : > { %1832 = vmatmul.msk.f32.gmra.mxu1 %vm263_vm1, %v1279_v6  ;;  %v1250_v52 = vadd.f32 %v1218_v26, %v1153_v60  ;;  %v739_v44 = vmul.f32 %v2794_v50, %v1971_v17  ;;  %v1062_v28 = vadd.f32 %v1030_v16, %v964_v11  ;;  %v1025_v53 = vmul.f32 %v1995_v27, %v2598_v61  ;;  %v1192_v26 = vld [vmem:[#allocation2 + $0x18a] sm:$0xff]  ;;  %v999_v16 = vld [vmem:[#allocation2 + $0x198] sm:$0xff] }
  0xca   : > { %v1122_v37 = vmul.f32 %v2005_v31, %v2611_v48  ;;  %v836_v19 = vmul.f32 %v2797_v46, %v1973_v18  ;;  %v862_v47 = vadd.f32 %v830_v21, %v765_v42  ;;  %v674_v24 = vadd.f32 %v642_v0, %v577_v10 }
  0xcb   : > { %v1286_v35 = vadd.f32 %v2708_v38, %v1250_v52  ;;  %v449_v62 = vmul.f32 %v2728_v43, %v1948_v3  ;;  %v1159_v8 = vadd.f32 %v1127_v58, %v1062_v28  ;;  %v1219_v61 = vmul.f32 %v2689_v55, %v2622_v57 }
  0xcc   : > { %v546_v48 = vmul.f32 %v2731_v63, %v1953_v5  ;;  %v643_v30 = vmul.f32 %v2748_v12, %v1958_v7  ;;  %v959_v1 = vadd.f32 %v927_v45, %v862_v47  ;;  %v771_v9 = vadd.f32 %v739_v44, %v674_v24 }
  0xcd   : > { %1839 = vmatmul.msk.f32.gmra.mxu2 %vm263_vm1, %v1286_v35  ;;  %v933_v22 = vmul.f32 %v2816_v29, %v1979_v20  ;;  %v1031_v43 = vmul.f32 %v1995_v27, %v998_v36  ;;  %v1256_v25 = vadd.f32 %v1224_v51, %v1159_v8  ;;  %v1128_v39 = vmul.f32 %v2005_v31, %v1095_v49 }
  0xce   : > { %v578_v57 = vadd.f32 %v546_v48, %v449_v62  ;;  %v740_v54 = vmul.f32 %v997_v59, %v1971_v17  ;;  %v1057_v63 = vadd.f32 %v1025_v53, %v959_v1  ;;  %v868_v56 = vadd.f32 %v836_v19, %v771_v9  ;;  %v2923_v59 = vld [vmem:[%s3183_s4] ss:$0 sm:$0xff]  ;;  %v1097_v62 = vld [vmem:[#allocation2 + $0x1a1] sm:$0xff] }
  0xcf   : > { %v837_v12 = vmul.f32 %v1094_v13, %v1973_v18  ;;  %v450_v32 = vmul.f32 %v2794_v50, %v1948_v3  ;;  %v1292_v41 = vadd.f32 %v2708_v38, %v1256_v25  ;;  %v547_v4 = vmul.f32 %v2797_v46, %v1953_v5  ;;  %v1193_v46 = vld [vmem:[#allocation2 + $0x19a] sm:$0xff]  ;;  %v1194_v25 = vld [vmem:[#allocation2 + $0x1a2] sm:$0xff] }
  0xd0   : > { %v675_v23 = vadd.f32 %v643_v30, %v578_v57  ;;  %v644_v58 = vmul.f32 %v2816_v29, %v1958_v7  ;;  %v1154_v13 = vadd.f32 %v1122_v37, %v1057_v63  ;;  %v965_v21 = vadd.f32 %v933_v22, %v868_v56 }
  0xd1   : > { %v1225_v3 = vmul.f32 %v2689_v55, %v1192_v26  ;;  %v934_v50 = vmul.f32 %v1191_v2, %v1979_v20  ;;  %1845 = vmatmul.msk.f32.gmra.mxu3 %vm263_vm1, %v1292_v41  ;;  %v1032_v5 = vmul.f32 %v1995_v27, %v999_v16  ;;  %v579_v6 = vadd.f32 %v547_v4, %v450_v32  ;;  %v1421_v2 = vpop.f32.mrf.mxu0 }
  0xd2   : > { %v772_v34 = vadd.f32 %v740_v54, %v675_v23  ;;  %v741_v7 = vmul.f32 %v998_v36, %v1971_v17  ;;  %v1251_v29 = vadd.f32 %v1219_v61, %v1154_v13  ;;  %v1063_v60 = vadd.f32 %v1031_v43, %v965_v21 }
  0xd3   : > { %v1129_v14 = vmul.f32 %v2005_v31, %v1096_v15  ;;  %v838_v33 = vmul.f32 %v1095_v49, %v1973_v18  ;;  %v676_v51 = vadd.f32 %v644_v58, %v579_v6  ;;  %v1419_v45 = vadd.f32 %v2923_v59, %v1418_v40  ;;  %v1000_v18 = vld [vmem:[#allocation2 + $0x1a0] sm:$0xff] }
  0xd4   : > { %v869_v11 = vadd.f32 %v837_v12, %v772_v34  ;;  %v1287_v17 = vadd.f32 %v2708_v38, %v1251_v29  ;;  %v1160_v0 = vadd.f32 %v1128_v39, %v1063_v60  ;;  %v1226_v52 = vmul.f32 %v2689_v55, %v1193_v46 }
  0xd5   : > { %v1422_v42 = vadd.f32 %v2923_v59, %v1421_v2  ;;  %v773_v44 = vadd.f32 %v741_v7, %v676_v51  ;;  %v935_v28 = vmul.f32 %v1192_v26, %v1979_v20  ;;  %v1586_v53 = vmul.f32 %v1419_v45, %v1419_v45  ;;  %1688 = vst.msk [vmem:[%s2937_s19] sm:$0xff] %vm1514_vm3, %v1419_v45 }
  0xd6   : > { %v966_v10 = vadd.f32 %v934_v50, %v869_v11  ;;  %1840 = vmatmul.msk.f32.gmra.mxu2 %vm263_vm1, %v1287_v17  ;;  %v1257_v37 = vadd.f32 %v1225_v3, %v1160_v0  ;;  %v1515_v19 = vsel %vm1514_vm3, %v1419_v45, 0.0  ;;  %v1033_v49 = vmul.f32 %v1995_v27, %v1000_v18 }
  0xd7   : > { %v1516_v36 = vsel %vm1514_vm3, %v1422_v42, 0.0  ;;  %v1587_v35 = vmul.f32 %v1422_v42, %v1422_v42  ;;  %1689 = vst.msk [vmem:[%s2937_s19 + $0x8] sm:$0xff] %vm1514_vm3, %v1422_v42  ;;  %v870_v24 = vadd.f32 %v838_v33, %v773_v44  ;;  %v1618_v8 = vsel %vm1514_vm3, %v1586_v53, 0.0 }
  0xd8   : > { %v1064_v47 = vadd.f32 %v1032_v5, %v966_v10  ;;  %v1517_v40 = vadd.f32 %v1516_v36, %v1515_v19  ;;  %v1293_v20 = vadd.f32 %v2708_v38, %v1257_v37  ;;  %v1130_v9 = vmul.f32 %v2005_v31, %v1097_v62 }
  0xd9   : > { %v1619_v61 = vsel %vm1514_vm3, %v1587_v35, 0.0  ;;  %v967_v30 = vadd.f32 %v935_v28, %v870_v24  ;;  %v1227_v26 = vmul.f32 %v2689_v55, %v1194_v25  ;;  %v1424_v57 = vpop.f32.mrf.mxu0 }
  0xda   : > { %v1161_v48 = vadd.f32 %v1129_v14, %v1064_v47  ;;  %v1620_v1 = vadd.f32 %v1619_v61, %v1618_v8  ;;  %1846 = vmatmul.msk.f32.gmra.mxu3 %vm263_vm1, %v1293_v20  ;;  %v1425_v54 = vadd.f32 %v2923_v59, %v1424_v57 }
  0xdb   : > { %v1065_v43 = vadd.f32 %v1033_v49, %v967_v30 }
  0xdc   : > { %v1258_v22 = vadd.f32 %v1226_v52, %v1161_v48  ;;  %v1518_v56 = vsel %vm1514_vm3, %v1425_v54, 0.0  ;;  %v1588_v12 = vmul.f32 %v1425_v54, %v1425_v54  ;;  %1690 = vst.msk [vmem:[%s2937_s19 + $0x10] sm:$0xff] %vm1514_vm3, %v1425_v54 }
  0xdd   : > { %v1162_v39 = vadd.f32 %v1130_v9, %v1065_v43  ;;  %v1519_v31 = vadd.f32 %v1518_v56, %v1517_v40 }
  0xde   : > { %v1294_v27 = vadd.f32 %v2708_v38, %v1258_v22  ;;  %v1621_v16 = vsel %vm1514_vm3, %v1588_v12, 0.0 }
  0xdf   : > { %v1259_v63 = vadd.f32 %v1227_v26, %v1162_v39  ;;  %v1622_v32 = vadd.f32 %v1621_v16, %v1620_v1 }
  0xe1   : > { %v1295_v41 = vadd.f32 %v2708_v38, %v1259_v63  ;;  %v1427_v55 = vpop.f32.mrf.mxu0 }
  0xe2   : > { %1847 = vmatmul.msk.f32.gmra.mxu3 %vm263_vm1, %v1294_v27  ;;  %v1428_v23 = vadd.f32 %v2923_v59, %v1427_v55 }
  0xe4   : > { %v1520_v15 = vsel %vm1514_vm3, %v1428_v23, 0.0  ;;  %v1589_v4 = vmul.f32 %v1428_v23, %v1428_v23  ;;  %1691 = vst.msk [vmem:[%s2937_s19 + $0x18] sm:$0xff] %vm1514_vm3, %v1428_v23 }
  0xe5   : > { %v1521_v13 = vadd.f32 %v1520_v15, %v1519_v31 }
  0xe6   : > { %v1623_v3 = vsel %vm1514_vm3, %v1589_v4, 0.0 }
  0xe7   : > { %v1624_v38 = vadd.f32 %v1623_v3, %v1622_v32 }
  0xea   : > { %1848 = vmatmul.msk.f32.gmra.mxu3 %vm263_vm1, %v1295_v41 }
  0xed   : > { %v1442_v58 = vpop.f32.mrf.mxu1 }
  0xee   : > { %v2972_v21 = vadd.f32 %v2923_v59, %v1442_v58 }
  0xf0   : > { %1696 = vst.msk [vmem:[%s2937_s19 + $0x40] sm:$0xff] %vm1514_vm3, %v2972_v21  ;;  %v1594_v25 = vmul.f32 %v2972_v21, %v2972_v21  ;;  %v1530_v63 = vsel %vm1514_vm3, %v2972_v21, 0.0 }
  0xf1   : > { %v1430_v50 = vpop.f32.mrf.mxu0 }
  0xf2   : > { %v1431_v34 = vadd.f32 %v2923_v59, %v1430_v50  ;;  %v1633_v55 = vsel %vm1514_vm3, %v1594_v25, 0.0 }
  0xf4   : > { %v1522_v46 = vsel %vm1514_vm3, %v1431_v34, 0.0  ;;  %v1590_v6 = vmul.f32 %v1431_v34, %v1431_v34  ;;  %1692 = vst.msk [vmem:[%s2937_s19 + $0x20] sm:$0xff] %vm1514_vm3, %v1431_v34 }
  0xf5   : > { %v1445_v5 = vpop.f32.mrf.mxu1  ;;  %v1523_v29 = vadd.f32 %v1522_v46, %v1521_v13 }
  0xf6   : > { %v2983_v7 = vadd.f32 %v2923_v59, %v1445_v5  ;;  %v1625_v60 = vsel %vm1514_vm3, %v1590_v6, 0.0 }
  0xf7   : > { %v1626_v14 = vadd.f32 %v1625_v60, %v1624_v38 }
  0xf8   : > { %1697 = vst.msk [vmem:[%s2937_s19 + $0x48] sm:$0xff] %vm1514_vm3, %v2983_v7  ;;  %v1595_v56 = vmul.f32 %v2983_v7, %v2983_v7  ;;  %v1532_v23 = vsel %vm1514_vm3, %v2983_v7, 0.0 }
  0xf9   : > { %v1466_v33 = vpop.f32.mrf.mxu2 }
  0xfa   : > { %v2990_v2 = vadd.f32 %v2923_v59, %v1466_v33  ;;  %v1635_v13 = vsel %vm1514_vm3, %v1595_v56, 0.0 }
  0xfc   : > { %1704 = vst.msk [vmem:[%s2937_s19 + $0x80] sm:$0xff] %vm1514_vm3, %v2990_v2 }
  0xfd   : > { %v1448_v11 = vpop.f32.mrf.mxu1 }
  0xfe   : > { %v1449_v51 = vadd.f32 %v2923_v59, %v1448_v11  ;;  %v1433_v45 = vpop.f32.mrf.mxu0 }
  0xff   : > { %v1434_v17 = vadd.f32 %v2923_v59, %v1433_v45 }
 0x100   : > { %1698 = vst.msk [vmem:[%s2937_s19 + $0x50] sm:$0xff] %vm1514_vm3, %v1449_v51  ;;  %v1596_v15 = vmul.f32 %v1449_v51, %v1449_v51  ;;  %v1534_v21 = vsel %vm1514_vm3, %v1449_v51, 0.0 }
 0x101   : > { %1693 = vst.msk [vmem:[%s2937_s19 + $0x28] sm:$0xff] %vm1514_vm3, %v1434_v17  ;;  %v1591_v47 = vmul.f32 %v1434_v17, %v1434_v17  ;;  %v1524_v24 = vsel %vm1514_vm3, %v1434_v17, 0.0 }
 0x102   : > { %v1525_v61 = vadd.f32 %v1524_v24, %v1523_v29  ;;  %v1637_v34 = vsel %vm1514_vm3, %v1596_v15, 0.0 }
 0x103   : > { %v1627_v20 = vsel %vm1514_vm3, %v1591_v47, 0.0 }
 0x104   : > { %v1628_v9 = vadd.f32 %v1627_v20, %v1626_v14 }
 0x105   : > { %v1469_v0 = vpop.f32.mrf.mxu2 }
 0x106   : > { %v3002_v52 = vadd.f32 %v2923_v59, %v1469_v0  ;;  %v1451_v18 = vpop.f32.mrf.mxu1 }
 0x107   : > { %v1452_v42 = vadd.f32 %v2923_v59, %v1451_v18 }
 0x108   : > { %1705 = vst.msk [vmem:[%s2937_s19 + $0x88] sm:$0xff] %vm1514_vm3, %v3002_v52 }
 0x109   : > { %1699 = vst.msk [vmem:[%s2937_s19 + $0x58] sm:$0xff] %vm1514_vm3, %v1452_v42  ;;  %v1597_v3 = vmul.f32 %v1452_v42, %v1452_v42  ;;  %v1536_v5 = vsel %vm1514_vm3, %v1452_v42, 0.0 }
 0x10b   : > { %v1639_v7 = vsel %vm1514_vm3, %v1597_v3, 0.0 }
 0x111   : > { %v1472_v10 = vpop.f32.mrf.mxu2 }
 0x112   : > { %v3011_v44 = vadd.f32 %v2923_v59, %v1472_v10 }
 0x114   : > { %1706 = vst.msk [vmem:[%s2937_s19 + $0x90] sm:$0xff] %vm1514_vm3, %v3011_v44 }
 0x115   : > { %v1436_v28 = vpop.f32.mrf.mxu0 }
 0x116   : > { %v1437_v53 = vadd.f32 %v2923_v59, %v1436_v28  ;;  %v1490_v37 = vpop.f32.mrf.mxu3 }
 0x117   : > { %v3018_v19 = vadd.f32 %v2923_v59, %v1490_v37 }
 0x118   : > { %1694 = vst.msk [vmem:[%s2937_s19 + $0x30] sm:$0xff] %vm1514_vm3, %v1437_v53  ;;  %v1454_v36 = vpop.f32.mrf.mxu1  ;;  %v1592_v49 = vmul.f32 %v1437_v53, %v1437_v53  ;;  %v1526_v8 = vsel %vm1514_vm3, %v1437_v53, 0.0 }
 0x119   : > { %1712 = vst.msk [vmem:[%s2937_s19 + $0xc0] sm:$0xff] %vm1514_vm3, %v3018_v19  ;;  %v1455_v35 = vadd.f32 %v2923_v59, %v1454_v36  ;;  %v1527_v22 = vadd.f32 %v1526_v8, %v1525_v61 }
 0x11a   : > { %v1629_v30 = vsel %vm1514_vm3, %v1592_v49, 0.0 }
 0x11b   : > { %1700 = vst.msk [vmem:[%s2937_s19 + $0x60] sm:$0xff] %vm1514_vm3, %v1455_v35  ;;  %v1630_v57 = vadd.f32 %v1629_v30, %v1628_v9  ;;  %v1598_v45 = vmul.f32 %v1455_v35, %v1455_v35  ;;  %v1538_v0 = vsel %vm1514_vm3, %v1455_v35, 0.0 }
 0x11d   : > { %v1641_v42 = vsel %vm1514_vm3, %v1598_v45, 0.0 }
 0x123   : > { %v1475_v62 = vpop.f32.mrf.mxu2 }
 0x124   : > { %v3030_v40 = vadd.f32 %v2923_v59, %v1475_v62 }
 0x126   : > { %v1439_v48 = vpop.f32.mrf.mxu0  ;;  %1707 = vst.msk [vmem:[%s2937_s19 + $0x98] sm:$0xff] %vm1514_vm3, %v3030_v40 }
 0x127   : > { %v1440_v1 = vadd.f32 %v2923_v59, %v1439_v48 }
 0x128   : > { %v1493_v43 = vpop.f32.mrf.mxu3 }
 0x129   : > { %v1528_v27 = vsel %vm1514_vm3, %v1440_v1, 0.0  ;;  %v1593_v39 = vmul.f32 %v1440_v1, %v1440_v1  ;;  %1695 = vst.msk [vmem:[%s2937_s19 + $0x38] sm:$0xff] %vm1514_vm3, %v1440_v1  ;;  %v3045_v26 = vadd.f32 %v2923_v59, %v1493_v43 }
 0x12a   : > { %v1529_v54 = vadd.f32 %v1528_v27, %v1527_v22  ;;  %v1602_v22 = vmul.f32 %v2990_v2, %v2990_v2 }
 0x12b   : > { %v1631_v12 = vsel %vm1514_vm3, %v1593_v39, 0.0  ;;  %v1457_v31 = vpop.f32.mrf.mxu1  ;;  %1713 = vst.msk [vmem:[%s2937_s19 + $0xc8] sm:$0xff] %vm1514_vm3, %v3045_v26  ;;  %v1546_v39 = vsel %vm1514_vm3, %v2990_v2, 0.0 }
 0x12c   : > { %v1531_v16 = vadd.f32 %v1530_v63, %v1529_v54  ;;  %v1632_v32 = vadd.f32 %v1631_v12, %v1630_v57  ;;  %v1458_v41 = vadd.f32 %v2923_v59, %v1457_v31  ;;  %v1603_v57 = vmul.f32 %v3002_v52, %v3002_v52 }
 0x12d   : > { %v1649_v12 = vsel %vm1514_vm3, %v1602_v22, 0.0  ;;  %v1548_v31 = vsel %vm1514_vm3, %v3002_v52, 0.0  ;;  %v1552_v52 = vsel %vm1514_vm3, %v3030_v40, 0.0 }
 0x12e   : > { %v1533_v4 = vadd.f32 %v1532_v23, %v1531_v16  ;;  %v1634_v58 = vadd.f32 %v1633_v55, %v1632_v32  ;;  %1701 = vst.msk [vmem:[%s2937_s19 + $0x68] sm:$0xff] %vm1514_vm3, %v1458_v41  ;;  %v1599_v10 = vmul.f32 %v1458_v41, %v1458_v41  ;;  %v1540_v53 = vsel %vm1514_vm3, %v1458_v41, 0.0 }
 0x12f   : > { %v1604_v16 = vmul.f32 %v3011_v44, %v3011_v44  ;;  %v1651_v2 = vsel %vm1514_vm3, %v1603_v57, 0.0  ;;  %v1550_v55 = vsel %vm1514_vm3, %v3011_v44, 0.0  ;;  %v1605_v23 = vmul.f32 %v3030_v40, %v3030_v40 }
 0x130   : > { %v1636_v38 = vadd.f32 %v1635_v13, %v1634_v58  ;;  %v1535_v50 = vadd.f32 %v1534_v21, %v1533_v4  ;;  %v1643_v36 = vsel %vm1514_vm3, %v1599_v10, 0.0 }
 0x131   : > { %v1653_v13 = vsel %vm1514_vm3, %v1604_v16, 0.0 }
 0x132   : > { %v1537_v46 = vadd.f32 %v1536_v5, %v1535_v50  ;;  %v1638_v6 = vadd.f32 %v1637_v34, %v1636_v38  ;;  %v1655_v34 = vsel %vm1514_vm3, %v1605_v23, 0.0 }
 0x134   : > { %v1640_v29 = vadd.f32 %v1639_v7, %v1638_v6  ;;  %v1539_v18 = vadd.f32 %v1538_v0, %v1537_v46 }
 0x135   : > { %v1478_v60 = vpop.f32.mrf.mxu2 }
 0x136   : > { %v1479_v14 = vadd.f32 %v2923_v59, %v1478_v60  ;;  %v1642_v28 = vadd.f32 %v1641_v42, %v1640_v29  ;;  %v1541_v37 = vadd.f32 %v1540_v53, %v1539_v18 }
 0x138   : > { %v1460_v33 = vpop.f32.mrf.mxu1  ;;  %1708 = vst.msk [vmem:[%s2937_s19 + $0xa0] sm:$0xff] %vm1514_vm3, %v1479_v14  ;;  %v1644_v49 = vadd.f32 %v1643_v36, %v1642_v28  ;;  %v1606_v21 = vmul.f32 %v1479_v14, %v1479_v14  ;;  %v1554_v44 = vsel %vm1514_vm3, %v1479_v14, 0.0 }
 0x139   : > { %v1461_v11 = vadd.f32 %v2923_v59, %v1460_v33  ;;  %v1496_v51 = vpop.f32.mrf.mxu3 }
 0x13a   : > { %v3071_v17 = vadd.f32 %v2923_v59, %v1496_v51  ;;  %v1657_v7 = vsel %vm1514_vm3, %v1606_v21, 0.0 }
 0x13b   : > { %1702 = vst.msk [vmem:[%s2937_s19 + $0x70] sm:$0xff] %vm1514_vm3, %v1461_v11  ;;  %v1600_v47 = vmul.f32 %v1461_v11, %v1461_v11  ;;  %v1542_v62 = vsel %vm1514_vm3, %v1461_v11, 0.0 }
 0x13c   : > { %1714 = vst.msk [vmem:[%s2937_s19 + $0xd0] sm:$0xff] %vm1514_vm3, %v3071_v17  ;;  %v1543_v20 = vadd.f32 %v1542_v62, %v1541_v37  ;;  %v1610_v37 = vmul.f32 %v3018_v19, %v3018_v19  ;;  %v1611_v62 = vmul.f32 %v3045_v26, %v3045_v26  ;;  %v1612_v22 = vmul.f32 %v3071_v17, %v3071_v17 }
 0x13d   : > { %v1645_v61 = vsel %vm1514_vm3, %v1600_v47, 0.0 }
 0x13e   : > { %v1646_v1 = vadd.f32 %v1645_v61, %v1644_v49 }
 0x143   : > { %v1481_v24 = vpop.f32.mrf.mxu2 }
 0x144   : > { %v1482_v35 = vadd.f32 %v2923_v59, %v1481_v24 }
 0x146   : > { %v1463_v8 = vpop.f32.mrf.mxu1  ;;  %1709 = vst.msk [vmem:[%s2937_s19 + $0xa8] sm:$0xff] %vm1514_vm3, %v1482_v35  ;;  %v1607_v5 = vmul.f32 %v1482_v35, %v1482_v35  ;;  %v1556_v29 = vsel %vm1514_vm3, %v1482_v35, 0.0  ;;  %v1562_v35 = vsel %vm1514_vm3, %v3018_v19, 0.0 }
 0x147   : > { %v1464_v48 = vadd.f32 %v2923_v59, %v1463_v8  ;;  %v1499_v30 = vpop.f32.mrf.mxu3 }
 0x148   : > { %v3089_v9 = vadd.f32 %v2923_v59, %v1499_v30  ;;  %v1659_v51 = vsel %vm1514_vm3, %v1607_v5, 0.0  ;;  %v1665_v30 = vsel %vm1514_vm3, %v1610_v37, 0.0 }
 0x149   : > { %v1544_v43 = vsel %vm1514_vm3, %v1464_v48, 0.0  ;;  %v1601_v25 = vmul.f32 %v1464_v48, %v1464_v48  ;;  %1703 = vst.msk [vmem:[%s2937_s19 + $0x78] sm:$0xff] %vm1514_vm3, %v1464_v48 }
 0x14a   : > { %v1545_v27 = vadd.f32 %v1544_v43, %v1543_v20  ;;  %1715 = vst.msk [vmem:[%s2937_s19 + $0xd8] sm:$0xff] %vm1514_vm3, %v3089_v9 }
 0x14b   : > { %v1647_v54 = vsel %vm1514_vm3, %v1601_v25, 0.0  ;;  %v1667_v25 = vsel %vm1514_vm3, %v1611_v62, 0.0 }
 0x14c   : > { %v1547_v63 = vadd.f32 %v1546_v39, %v1545_v27  ;;  %v1648_v56 = vadd.f32 %v1647_v54, %v1646_v1  ;;  %v1564_v1 = vsel %vm1514_vm3, %v3045_v26, 0.0  ;;  %v1566_v27 = vsel %vm1514_vm3, %v3071_v17, 0.0 }
 0x14d   : > { %v1613_v39 = vmul.f32 %v3089_v9, %v3089_v9  ;;  %v1669_v26 = vsel %vm1514_vm3, %v1612_v22, 0.0 }
 0x14e   : > { %v1549_v32 = vadd.f32 %v1548_v31, %v1547_v63  ;;  %v1650_v41 = vadd.f32 %v1649_v12, %v1648_v56  ;;  %v1568_v63 = vsel %vm1514_vm3, %v3089_v9, 0.0 }
 0x150   : > { %v1652_v15 = vadd.f32 %v1651_v2, %v1650_v41  ;;  %v1551_v4 = vadd.f32 %v1550_v55, %v1549_v32  ;;  %v1484_v58 = vpop.f32.mrf.mxu2  ;;  %v1671_v32 = vsel %vm1514_vm3, %v1613_v39, 0.0 }
 0x151   : > { %v1485_v3 = vadd.f32 %v2923_v59, %v1484_v58 }
 0x152   : > { %v1553_v38 = vadd.f32 %v1552_v52, %v1551_v4  ;;  %v1654_v50 = vadd.f32 %v1653_v13, %v1652_v15 }
 0x153   : > { %1710 = vst.msk [vmem:[%s2937_s19 + $0xb0] sm:$0xff] %vm1514_vm3, %v1485_v3  ;;  %v1608_v45 = vmul.f32 %v1485_v3, %v1485_v3  ;;  %v1558_v14 = vsel %vm1514_vm3, %v1485_v3, 0.0 }
 0x154   : > { %v1555_v46 = vadd.f32 %v1554_v44, %v1553_v38  ;;  %v1656_v6 = vadd.f32 %v1655_v34, %v1654_v50  ;;  %v1502_v40 = vpop.f32.mrf.mxu3 }
 0x155   : > { %v1503_v11 = vadd.f32 %v2923_v59, %v1502_v40  ;;  %v1661_v10 = vsel %vm1514_vm3, %v1608_v45, 0.0 }
 0x156   : > { %v1557_v60 = vadd.f32 %v1556_v29, %v1555_v46  ;;  %v1658_v33 = vadd.f32 %v1657_v7, %v1656_v6 }
 0x157   : > { %1716 = vst.msk [vmem:[%s2937_s19 + $0xe0] sm:$0xff] %vm1514_vm3, %v1503_v11  ;;  %v1614_v56 = vmul.f32 %v1503_v11, %v1503_v11  ;;  %v1570_v41 = vsel %vm1514_vm3, %v1503_v11, 0.0 }
 0x158   : > { %v1660_v0 = vadd.f32 %v1659_v51, %v1658_v33  ;;  %v1559_v18 = vadd.f32 %v1558_v14, %v1557_v60 }
 0x159   : > { %v1487_v42 = vpop.f32.mrf.mxu2  ;;  %v1673_v15 = vsel %vm1514_vm3, %v1614_v56, 0.0 }
 0x15a   : > { %v1488_v28 = vadd.f32 %v2923_v59, %v1487_v42  ;;  %v1662_v53 = vadd.f32 %v1661_v10, %v1660_v0 }
 0x15c   : > { %v1560_v36 = vsel %vm1514_vm3, %v1488_v28, 0.0  ;;  %v1609_v47 = vmul.f32 %v1488_v28, %v1488_v28  ;;  %1711 = vst.msk [vmem:[%s2937_s19 + $0xb8] sm:$0xff] %vm1514_vm3, %v1488_v28 }
 0x15d   : > { %v1561_v24 = vadd.f32 %v1560_v36, %v1559_v18  ;;  %v1505_v49 = vpop.f32.mrf.mxu3 }
 0x15e   : > { %v1663_v20 = vsel %vm1514_vm3, %v1609_v47, 0.0  ;;  %v1506_v8 = vadd.f32 %v2923_v59, %v1505_v49 }
 0x15f   : > { %v1563_v61 = vadd.f32 %v1562_v35, %v1561_v24  ;;  %v1664_v48 = vadd.f32 %v1663_v20, %v1662_v53 }
 0x160   : > { %1717 = vst.msk [vmem:[%s2937_s19 + $0xe8] sm:$0xff] %vm1514_vm3, %v1506_v8  ;;  %v1615_v17 = vmul.f32 %v1506_v8, %v1506_v8  ;;  %v1572_v4 = vsel %vm1514_vm3, %v1506_v8, 0.0 }
 0x161   : > { %v1565_v19 = vadd.f32 %v1564_v1, %v1563_v61  ;;  %v1666_v43 = vadd.f32 %v1665_v30, %v1664_v48 }
 0x162   : > { %v1675_v13 = vsel %vm1514_vm3, %v1615_v17, 0.0 }
 0x163   : > { %v1668_v57 = vadd.f32 %v1667_v25, %v1666_v43  ;;  %v1567_v54 = vadd.f32 %v1566_v27, %v1565_v19 }
 0x165   : > { %v1569_v12 = vadd.f32 %v1568_v63, %v1567_v54  ;;  %v1670_v31 = vadd.f32 %v1669_v26, %v1668_v57  ;;  %v1508_v16 = vpop.f32.mrf.mxu3 }
 0x166   : > { %v1509_v2 = vadd.f32 %v2923_v59, %v1508_v16 }
 0x167   : > { %v1571_v55 = vadd.f32 %v1570_v41, %v1569_v12  ;;  %v1672_v23 = vadd.f32 %v1671_v32, %v1670_v31 }
 0x168   : > { %1718 = vst.msk [vmem:[%s2937_s19 + $0xf0] sm:$0xff] %vm1514_vm3, %v1509_v2  ;;  %v1616_v52 = vmul.f32 %v1509_v2, %v1509_v2  ;;  %v1574_v3 = vsel %vm1514_vm3, %v1509_v2, 0.0 }
 0x169   : > { %v1573_v9 = vadd.f32 %v1572_v4, %v1571_v55  ;;  %v1674_v58 = vadd.f32 %v1673_v15, %v1672_v23 }
 0x16a   : > { %v1677_v34 = vsel %vm1514_vm3, %v1616_v52, 0.0 }
 0x16b   : > { %v1676_v21 = vadd.f32 %v1675_v13, %v1674_v58  ;;  %v1575_v38 = vadd.f32 %v1574_v3, %v1573_v9 }
 0x16d   : > { %v1511_v50 = vpop.f32.mrf.mxu3  ;;  %v1678_v5 = vadd.f32 %v1677_v34, %v1676_v21 }
 0x16e   : > { %v1512_v44 = vadd.f32 %v2923_v59, %v1511_v50 }
 0x170   : > { %v1576_v46 = vsel %vm1514_vm3, %v1512_v44, 0.0  ;;  %v1617_v6 = vmul.f32 %v1512_v44, %v1512_v44  ;;  %1719 = vst.msk [vmem:[%s2937_s19 + $0xf8] sm:$0xff] %vm1514_vm3, %v1512_v44 }
 0x171   : > { %v1577_v7 = vadd.f32 %v1576_v46, %v1575_v38 }
 0x172   : > { %v1679_v29 = vsel %vm1514_vm3, %v1617_v6, 0.0 }
 0x173   : > { %v1578_v40 = vrot.slane %v1577_v7, 4  ;;  %v1680_v60 = vadd.f32 %v1679_v29, %v1678_v5 }
 0x175   : > { %v1579_v33 = vadd.f32 %v1578_v40, %v1577_v7  ;;  %v1681_v11 = vrot.slane %v1680_v60, 4 }
 0x177   : > { %v1580_v51 = vrot.slane %v1579_v33, 2  ;;  %v1682_v45 = vadd.f32 %v1681_v11, %v1680_v60 }
 0x179   : > { %v1581_v0 = vadd.f32 %v1580_v51, %v1579_v33  ;;  %v1683_v14 = vrot.slane %v1682_v45, 2 }
 0x17b   : > { %v1582_v18 = vrot.slane %v1581_v0, 1  ;;  %v1684_v59 = vadd.f32 %v1683_v14, %v1682_v45 }
 0x17d   : > { %v1583_v42 = vadd.f32 %v1582_v18, %v1581_v0  ;;  %v1685_v10 = vrot.slane %v1684_v59, 1 }
 0x17f   : > { %1585 = vst.msk [vmem:[%s262_s25] sm:$0x1] %vm1584_vm4, %v1583_v42  ;;  %v1686_v28 = vadd.f32 %v1685_v10, %v1684_v59 }
 0x181   : > { %1687 = vst.msk [vmem:[%s262_s25 + $0x1] sm:$0x1] %vm1584_vm4, %v1686_v28 }
 0x182 PF: > { %s17_s21 = sadd.s32 1, %s1876_s21  }
 0x183   : > { %p14_p4 = scmp.ge.s32.totalorder %s17_s21, 4  }
 0x185   :  { %16 = sbr.rel (!%p14_p4) target bundleno = 1 (0x1), region = 84 }

</bundles_post_ra>
